<compile_context>
chip_gen: v5e
topology: v5e:2x2
jax: 0.10.0
libtpu: 0.0.40
codegen_flags: <defaults>
</compile_context>

<pallas_src>
import functools

import jax
import jax.numpy as jnp
from jax import lax
from jax.experimental import pallas as pl
from jax.experimental.pallas import tpu as pltpu

# ----------------------------- block configuration ------------------------------
DIM = 32                       # embed dim (C)
HEADS = 4                      # num_heads
HEAD_DIM = DIM // HEADS        # 8
MLP_RATIO = 4.0
HIDDEN = int(DIM * MLP_RATIO)  # 128 (fills the 128-lane vreg exactly for fc1/GELU)
SEQ = 17                       # tokens per sequence (16 patches + cls, ViT-style)
LN_EPS = 1e-6                  # norm_layer = partial(nn.LayerNorm, eps=1e-6) in ViT_flower
QKV_BIAS = True


# ------------------------------ fused block kernel -------------------------------
def _encoder_block_kernel(x_ref,
                          ln1_g, ln1_b,
                          qkv_w, qkv_b,
                          proj_w, proj_b,
                          ln2_g, ln2_b,
                          fc1_w, fc1_b,
                          fc2_w, fc2_b,
                          o_ref,
                          *, num_heads, head_dim, scale, eps):
    """One grid step = one batch element. Everything stays in VMEM/vregs."""
    x = x_ref[0]                                   # (N, D) float32
    d_model = num_heads * head_dim

    def layer_norm(t, g_ref, b_ref):
        mu = jnp.mean(t, axis=-1, keepdims=True)
        tc = t - mu
        var = jnp.mean(tc * tc, axis=-1, keepdims=True)
        return tc * lax.rsqrt(var + eps) * g_ref[...] + b_ref[...]

    # ----------------------------- attention branch ------------------------------
    y = layer_norm(x, ln1_g, ln1_b)                                    # (N, D)
    # single fused QKV matmul (denser MXU use than 3*H tiny matmuls)
    qkv = jnp.dot(y, qkv_w[...], preferred_element_type=jnp.float32) + qkv_b[...]

    # accumulate head outputs straight through the output projection:
    #   sum_h (softmax(q_h k_hᵀ * scale) v_h) @ proj_w[h*hd:(h+1)*hd, :]  + proj_b
    # (mathematically identical to concat-then-proj, avoids an in-kernel concat)
    attn = proj_b[...]                                                 # (1, D) -> bcast
    for h in range(num_heads):                                         # unrolled: 4 independent chains -> ILP
        lo = h * head_dim
        # fold the softmax scale into the (N, hd) q slice — cheaper than scaling (N, N) scores
        qh = qkv[:, lo:lo + head_dim] * scale                          # (N, hd)
        kh = qkv[:, d_model + lo:d_model + lo + head_dim]              # (N, hd)
        vh = qkv[:, 2 * d_model + lo:2 * d_model + lo + head_dim]      # (N, hd)

        # contract last dims directly — no explicit k.T / XLU transpose
        s = lax.dot_general(qh, kh, (((1,), (1,)), ((), ())),
                            preferred_element_type=jnp.float32)        # (N, N)
        s = s - jnp.max(s, axis=-1, keepdims=True)
        p = jnp.exp(s)
        # EUP approx reciprocal for the softmax denominator (~1e-3 rel. dev.)
        p = p * pl.reciprocal(jnp.sum(p, axis=-1, keepdims=True), approx=True)

        oh = jnp.dot(p, vh, preferred_element_type=jnp.float32)        # (N, hd)
        # proj_w row-slices [h*8:(h+1)*8] align exactly with sublane tiles -> no copy
        attn = attn + jnp.dot(oh, proj_w[pl.ds(lo, head_dim), :],
                              preferred_element_type=jnp.float32)      # (N, D)
    x = x + attn                                                       # drop_path = Identity

    # -------------------------------- MLP branch ---------------------------------
    y = layer_norm(x, ln2_g, ln2_b)
    h1 = jnp.dot(y, fc1_w[...], preferred_element_type=jnp.float32) + fc1_b[...]
    h1 = 0.5 * h1 * (1.0 + lax.erf(h1 * (2.0 ** -0.5)))                # exact GELU (nn.GELU default)
    mlp = jnp.dot(h1, fc2_w[...], preferred_element_type=jnp.float32) + fc2_b[...]
    o_ref[0] = (x + mlp).astype(o_ref.dtype)


# ------------------------------- pallas_call wrapper ------------------------------
def encoder_block(x, params, *, num_heads=HEADS, eps=LN_EPS):
    """x: (B, N, D) float32 -> (B, N, D) float32. One fused kernel, grid over batch."""
    B, N, D = x.shape
    hd = D // num_heads
    hid = params["fc1_w"].shape[1]
    scale = hd ** -0.5

    kern = functools.partial(_encoder_block_kernel, num_heads=num_heads,
                             head_dim=hd, scale=scale, eps=eps)

    def full(shape):  # whole-array block, constant index => fetched once, kept in VMEM
        nd = len(shape)
        return pl.BlockSpec(shape, lambda b: (0,) * nd)

    seq_spec = pl.BlockSpec((1, N, D), lambda b: (b, 0, 0))

    # Advisory cost estimate for XLA's scheduler around the custom call.
    flops = B * (2 * N * D * 3 * D                      # qkv
                 + 2 * num_heads * N * N * hd           # q·kᵀ
                 + 2 * num_heads * N * N * hd           # p·v
                 + 2 * N * D * D                        # output projection
                 + 2 * N * D * hid                      # fc1
                 + 2 * N * hid * D)                     # fc2
    transcendentals = B * (num_heads * N * N + N * hid)  # softmax exp + GELU erf
    param_bytes = 4 * (2 * D + D * 3 * D + 3 * D + D * D + D
                       + 2 * D + D * hid + hid + hid * D + D)
    bytes_accessed = 2 * x.size * 4 + param_bytes

    return pl.pallas_call(
        kern,
        out_shape=jax.ShapeDtypeStruct((B, N, D), jnp.float32),
        grid=(B,),
        in_specs=[
            seq_spec,                                   # x
            full((1, D)), full((1, D)),                 # ln1 gamma / beta
            full((D, 3 * D)), full((1, 3 * D)),         # qkv weight / bias
            full((D, D)), full((1, D)),                 # proj weight / bias
            full((1, D)), full((1, D)),                 # ln2 gamma / beta
            full((D, hid)), full((1, hid)),             # fc1 weight / bias
            full((hid, D)), full((1, D)),               # fc2 weight / bias
        ],
        out_specs=seq_spec,
        compiler_params=pltpu.CompilerParams(
            dimension_semantics=("parallel",),          # shard batch across TCs (v7x)
        ),
        cost_estimate=pl.CostEstimate(flops=flops,
                                      transcendentals=transcendentals,
                                      bytes_accessed=bytes_accessed),
    )(x,
      params["ln1_g"].reshape(1, D), params["ln1_b"].reshape(1, D),
      params["qkv_w"], params["qkv_b"].reshape(1, 3 * D),
      params["proj_w"], params["proj_b"].reshape(1, D),
      params["ln2_g"].reshape(1, D), params["ln2_b"].reshape(1, D),
      params["fc1_w"], params["fc1_b"].reshape(1, hid),
      params["fc2_w"], params["fc2_b"].reshape(1, D))


# ------------------------------ pure-JAX reference --------------------------------
def encoder_block_ref(x, params, *, num_heads=HEADS, eps=LN_EPS):
    B, N, D = x.shape
    hd = D // num_heads
    scale = hd ** -0.5

    def ln(t, g, b):
        mu = t.mean(-1, keepdims=True)
        var = ((t - mu) ** 2).mean(-1, keepdims=True)
        return (t - mu) / jnp.sqrt(var + eps) * g + b

    y = ln(x, params["ln1_g"], params["ln1_b"])
    qkv = y @ params["qkv_w"] + params["qkv_b"]
    qkv = qkv.reshape(B, N, 3, num_heads, hd).transpose(2, 0, 3, 1, 4)
    q, k, v = qkv[0], qkv[1], qkv[2]
    s = jnp.einsum("bhqd,bhkd->bhqk", q, k) * scale
    p = jax.nn.softmax(s, axis=-1)
    o = jnp.einsum("bhqk,bhkd->bhqd", p, v).transpose(0, 2, 1, 3).reshape(B, N, D)
    x = x + (o @ params["proj_w"] + params["proj_b"])
    y = ln(x, params["ln2_g"], params["ln2_b"])
    h = y @ params["fc1_w"] + params["fc1_b"]
    h = 0.5 * h * (1.0 + lax.erf(h * (2.0 ** -0.5)))
    x = x + (h @ params["fc2_w"] + params["fc2_b"])
    return x


# ------------------------------ parameter initialization --------------------------
def init_params(key):
    ks = jax.random.split(key, 6)

    def tn(k, shape, std=0.02):
        return std * jax.random.truncated_normal(k, -2.0, 2.0, shape, jnp.float32)

    return {
        "ln1_g": jnp.ones((DIM,), jnp.float32),
        "ln1_b": jnp.zeros((DIM,), jnp.float32),
        "qkv_w": tn(ks[0], (DIM, 3 * DIM)),
        "qkv_b": (tn(ks[1], (3 * DIM,)) if QKV_BIAS
                  else jnp.zeros((3 * DIM,), jnp.float32)),
        "proj_w": tn(ks[2], (DIM, DIM)),
        "proj_b": jnp.zeros((DIM,), jnp.float32),
        "ln2_g": jnp.ones((DIM,), jnp.float32),
        "ln2_b": jnp.zeros((DIM,), jnp.float32),
        "fc1_w": tn(ks[3], (DIM, HIDDEN)),
        "fc1_b": jnp.zeros((HIDDEN,), jnp.float32),
        "fc2_w": tn(ks[4], (HIDDEN, DIM)),
        "fc2_b": jnp.zeros((DIM,), jnp.float32),
    }


# -------------------------------------- main --------------------------------------
if __name__ == "__main__":
    root = jax.random.PRNGKey(0)
    k_x, k_p = jax.random.split(root)

    B = 2
    x = jax.random.normal(k_x, (B, SEQ, DIM), jnp.float32)   # (B, N, C) like the module
    params = init_params(k_p)

    fwd = jax.jit(functools.partial(encoder_block, num_heads=HEADS, eps=LN_EPS))
    out = fwd(x, params)
    jax.block_until_ready(out)

    assert out.shape == (B, SEQ, DIM) and out.dtype == jnp.float32

    ref = encoder_block_ref(x, params, num_heads=HEADS, eps=LN_EPS)
    err = float(jnp.max(jnp.abs(out - ref)))
    assert err < 1e-2, f"max abs error vs reference: {err}"

    print("KERNEL_OK")
</pallas_src>

<mosaic_0001>
module attributes {stable_mosaic.version = 11 : i64} {
  func.func @_encoder_block_kernel(%arg0: i32, %arg1: memref<1x17x32xf32, #tpu.memory_space<vmem>>, %arg2: memref<1x32xf32, #tpu.memory_space<vmem>>, %arg3: memref<1x32xf32, #tpu.memory_space<vmem>>, %arg4: memref<32x96xf32, #tpu.memory_space<vmem>>, %arg5: memref<1x96xf32, #tpu.memory_space<vmem>>, %arg6: memref<32x32xf32, #tpu.memory_space<vmem>>, %arg7: memref<1x32xf32, #tpu.memory_space<vmem>>, %arg8: memref<1x32xf32, #tpu.memory_space<vmem>>, %arg9: memref<1x32xf32, #tpu.memory_space<vmem>>, %arg10: memref<32x128xf32, #tpu.memory_space<vmem>>, %arg11: memref<1x128xf32, #tpu.memory_space<vmem>>, %arg12: memref<128x32xf32, #tpu.memory_space<vmem>>, %arg13: memref<1x32xf32, #tpu.memory_space<vmem>>, %arg14: memref<1x17x32xf32, #tpu.memory_space<vmem>>) attributes {dimension_semantics = [#tpu.dimension_semantics<parallel>], iteration_bounds = array<i64: 2>, scalar_prefetch = 0 : i64, scratch_operands = 0 : i64, tpu.core_type = #tpu.core_type<tc>, window_params = [{transform_indices = @transform_0, window_bounds = array<i64: 1, 17, 32>}, {pipeline_mode = #tpu.pipeline_mode<synchronous>, transform_indices = @transform_1, window_bounds = array<i64: 1, 32>}, {pipeline_mode = #tpu.pipeline_mode<synchronous>, transform_indices = @transform_2, window_bounds = array<i64: 1, 32>}, {pipeline_mode = #tpu.pipeline_mode<synchronous>, transform_indices = @transform_3, window_bounds = array<i64: 32, 96>}, {pipeline_mode = #tpu.pipeline_mode<synchronous>, transform_indices = @transform_4, window_bounds = array<i64: 1, 96>}, {pipeline_mode = #tpu.pipeline_mode<synchronous>, transform_indices = @transform_5, window_bounds = array<i64: 32, 32>}, {pipeline_mode = #tpu.pipeline_mode<synchronous>, transform_indices = @transform_6, window_bounds = array<i64: 1, 32>}, {pipeline_mode = #tpu.pipeline_mode<synchronous>, transform_indices = @transform_7, window_bounds = array<i64: 1, 32>}, {pipeline_mode = #tpu.pipeline_mode<synchronous>, transform_indices = @transform_8, window_bounds = array<i64: 1, 32>}, {pipeline_mode = #tpu.pipeline_mode<synchronous>, transform_indices = @transform_9, window_bounds = array<i64: 32, 128>}, {pipeline_mode = #tpu.pipeline_mode<synchronous>, transform_indices = @transform_10, window_bounds = array<i64: 1, 128>}, {pipeline_mode = #tpu.pipeline_mode<synchronous>, transform_indices = @transform_11, window_bounds = array<i64: 128, 32>}, {pipeline_mode = #tpu.pipeline_mode<synchronous>, transform_indices = @transform_12, window_bounds = array<i64: 1, 32>}, {transform_indices = @transform_13, window_bounds = array<i64: 1, 17, 32>}]} {
    %c0 = arith.constant 0 : index
    %c0_0 = arith.constant 0 : index
    %c0_1 = arith.constant 0 : index
    %0 = vector.load %arg1[%c0, %c0_0, %c0_1] : memref<1x17x32xf32, #tpu.memory_space<vmem>>, vector<1x17x32xf32>
    %1 = vector.shape_cast %0 : vector<1x17x32xf32> to vector<17x32xf32>
    %cst = arith.constant dense<0.000000e+00> : vector<17xf32>
    %2 = vector.multi_reduction <add>, %1, %cst [1] : vector<17x32xf32> to vector<17xf32>
    %3 = vector.shape_cast %2 : vector<17xf32> to vector<17x1xf32>
    %cst_2 = arith.constant 3.200000e+01 : f32
    %4 = vector.broadcast %cst_2 : f32 to vector<17x1xf32>
    %5 = arith.divf %3, %4 : vector<17x1xf32>
    %6 = vector.broadcast %5 : vector<17x1xf32> to vector<17x32xf32>
    %7 = arith.subf %1, %6 : vector<17x32xf32>
    %8 = arith.mulf %7, %7 : vector<17x32xf32>
    %cst_3 = arith.constant dense<0.000000e+00> : vector<17xf32>
    %9 = vector.multi_reduction <add>, %8, %cst_3 [1] : vector<17x32xf32> to vector<17xf32>
    %10 = vector.shape_cast %9 : vector<17xf32> to vector<17x1xf32>
    %cst_4 = arith.constant 3.200000e+01 : f32
    %11 = vector.broadcast %cst_4 : f32 to vector<17x1xf32>
    %12 = arith.divf %10, %11 : vector<17x1xf32>
    %cst_5 = arith.constant 9.99999997E-7 : f32
    %13 = vector.broadcast %cst_5 : f32 to vector<17x1xf32>
    %14 = arith.addf %12, %13 : vector<17x1xf32>
    %15 = math.rsqrt %14 : vector<17x1xf32>
    %16 = vector.broadcast %15 : vector<17x1xf32> to vector<17x32xf32>
    %17 = arith.mulf %7, %16 : vector<17x32xf32>
    %c0_6 = arith.constant 0 : index
    %c0_7 = arith.constant 0 : index
    %18 = vector.load %arg2[%c0_6, %c0_7] : memref<1x32xf32, #tpu.memory_space<vmem>>, vector<1x32xf32>
    %19 = vector.broadcast %18 : vector<1x32xf32> to vector<17x32xf32>
    %20 = arith.mulf %17, %19 : vector<17x32xf32>
    %c0_8 = arith.constant 0 : index
    %c0_9 = arith.constant 0 : index
    %21 = vector.load %arg3[%c0_8, %c0_9] : memref<1x32xf32, #tpu.memory_space<vmem>>, vector<1x32xf32>
    %22 = vector.broadcast %21 : vector<1x32xf32> to vector<17x32xf32>
    %23 = arith.addf %20, %22 : vector<17x32xf32>
    %c0_10 = arith.constant 0 : index
    %c0_11 = arith.constant 0 : index
    %24 = vector.load %arg4[%c0_10, %c0_11] : memref<32x96xf32, #tpu.memory_space<vmem>>, vector<32x96xf32>
    %cst_12 = arith.constant dense<0.000000e+00> : vector<17x96xf32>
    %25 = tpu.matmul %23, %24, %cst_12 {dimension_numbers = #tpu.dot_dimension_numbers<[1], [0], [0], [1], [0, 0, 1, 1], [], []>} : vector<17x32xf32>, vector<32x96xf32>, vector<17x96xf32> -> vector<17x96xf32>
    %c0_13 = arith.constant 0 : index
    %c0_14 = arith.constant 0 : index
    %26 = vector.load %arg5[%c0_13, %c0_14] : memref<1x96xf32, #tpu.memory_space<vmem>>, vector<1x96xf32>
    %27 = vector.broadcast %26 : vector<1x96xf32> to vector<17x96xf32>
    %28 = arith.addf %25, %27 : vector<17x96xf32>
    %c0_15 = arith.constant 0 : index
    %c0_16 = arith.constant 0 : index
    %29 = vector.load %arg7[%c0_15, %c0_16] : memref<1x32xf32, #tpu.memory_space<vmem>>, vector<1x32xf32>
    %30 = vector.extract_strided_slice %28 {offsets = [0, 0], sizes = [17, 8], strides = [1, 1]} : vector<17x96xf32> to vector<17x8xf32>
    %cst_17 = arith.constant 0.353553385 : f32
    %31 = vector.broadcast %cst_17 : f32 to vector<17x8xf32>
    %32 = arith.mulf %30, %31 : vector<17x8xf32>
    %33 = vector.extract_strided_slice %28 {offsets = [0, 32], sizes = [17, 8], strides = [1, 1]} : vector<17x96xf32> to vector<17x8xf32>
    %34 = vector.extract_strided_slice %28 {offsets = [0, 64], sizes = [17, 8], strides = [1, 1]} : vector<17x96xf32> to vector<17x8xf32>
    %cst_18 = arith.constant dense<0.000000e+00> : vector<17x17xf32>
    %35 = tpu.matmul %32, %33, %cst_18 {dimension_numbers = #tpu.dot_dimension_numbers<[1], [1], [0], [0], [0, 0, 1, 0], [], []>} : vector<17x8xf32>, vector<17x8xf32>, vector<17x17xf32> -> vector<17x17xf32>
    %cst_19 = arith.constant dense<0xFF800000> : vector<17xf32>
    %36 = vector.multi_reduction <maximumf>, %35, %cst_19 [1] : vector<17x17xf32> to vector<17xf32>
    %37 = vector.shape_cast %36 : vector<17xf32> to vector<17x1xf32>
    %38 = vector.broadcast %37 : vector<17x1xf32> to vector<17x17xf32>
    %39 = arith.subf %35, %38 : vector<17x17xf32>
    %40 = math.exp %39 : vector<17x17xf32>
    %cst_20 = arith.constant dense<0.000000e+00> : vector<17xf32>
    %41 = vector.multi_reduction <add>, %40, %cst_20 [1] : vector<17x17xf32> to vector<17xf32>
    %42 = vector.shape_cast %41 : vector<17xf32> to vector<17x1xf32>
    %43 = tpu.reciprocal %42 {approx = true} : vector<17x1xf32> -> vector<17x1xf32>
    %44 = vector.broadcast %43 : vector<17x1xf32> to vector<17x17xf32>
    %45 = arith.mulf %40, %44 : vector<17x17xf32>
    %cst_21 = arith.constant dense<0.000000e+00> : vector<17x8xf32>
    %46 = tpu.matmul %45, %34, %cst_21 {dimension_numbers = #tpu.dot_dimension_numbers<[1], [0], [0], [1], [0, 0, 1, 1], [], []>} : vector<17x17xf32>, vector<17x8xf32>, vector<17x8xf32> -> vector<17x8xf32>
    %c0_22 = arith.constant 0 : index
    %c0_23 = arith.constant 0 : index
    %47 = vector.load %arg6[%c0_22, %c0_23] : memref<32x32xf32, #tpu.memory_space<vmem>>, vector<8x32xf32>
    %cst_24 = arith.constant dense<0.000000e+00> : vector<17x32xf32>
    %48 = tpu.matmul %46, %47, %cst_24 {dimension_numbers = #tpu.dot_dimension_numbers<[1], [0], [0], [1], [0, 0, 1, 1], [], []>} : vector<17x8xf32>, vector<8x32xf32>, vector<17x32xf32> -> vector<17x32xf32>
    %49 = vector.broadcast %29 : vector<1x32xf32> to vector<17x32xf32>
    %50 = arith.addf %49, %48 : vector<17x32xf32>
    %51 = vector.extract_strided_slice %28 {offsets = [0, 8], sizes = [17, 8], strides = [1, 1]} : vector<17x96xf32> to vector<17x8xf32>
    %cst_25 = arith.constant 0.353553385 : f32
    %52 = vector.broadcast %cst_25 : f32 to vector<17x8xf32>
    %53 = arith.mulf %51, %52 : vector<17x8xf32>
    %54 = vector.extract_strided_slice %28 {offsets = [0, 40], sizes = [17, 8], strides = [1, 1]} : vector<17x96xf32> to vector<17x8xf32>
    %55 = vector.extract_strided_slice %28 {offsets = [0, 72], sizes = [17, 8], strides = [1, 1]} : vector<17x96xf32> to vector<17x8xf32>
    %cst_26 = arith.constant dense<0.000000e+00> : vector<17x17xf32>
    %56 = tpu.matmul %53, %54, %cst_26 {dimension_numbers = #tpu.dot_dimension_numbers<[1], [1], [0], [0], [0, 0, 1, 0], [], []>} : vector<17x8xf32>, vector<17x8xf32>, vector<17x17xf32> -> vector<17x17xf32>
    %cst_27 = arith.constant dense<0xFF800000> : vector<17xf32>
    %57 = vector.multi_reduction <maximumf>, %56, %cst_27 [1] : vector<17x17xf32> to vector<17xf32>
    %58 = vector.shape_cast %57 : vector<17xf32> to vector<17x1xf32>
    %59 = vector.broadcast %58 : vector<17x1xf32> to vector<17x17xf32>
    %60 = arith.subf %56, %59 : vector<17x17xf32>
    %61 = math.exp %60 : vector<17x17xf32>
    %cst_28 = arith.constant dense<0.000000e+00> : vector<17xf32>
    %62 = vector.multi_reduction <add>, %61, %cst_28 [1] : vector<17x17xf32> to vector<17xf32>
    %63 = vector.shape_cast %62 : vector<17xf32> to vector<17x1xf32>
    %64 = tpu.reciprocal %63 {approx = true} : vector<17x1xf32> -> vector<17x1xf32>
    %65 = vector.broadcast %64 : vector<17x1xf32> to vector<17x17xf32>
    %66 = arith.mulf %61, %65 : vector<17x17xf32>
    %cst_29 = arith.constant dense<0.000000e+00> : vector<17x8xf32>
    %67 = tpu.matmul %66, %55, %cst_29 {dimension_numbers = #tpu.dot_dimension_numbers<[1], [0], [0], [1], [0, 0, 1, 1], [], []>} : vector<17x17xf32>, vector<17x8xf32>, vector<17x8xf32> -> vector<17x8xf32>
    %c8 = arith.constant 8 : index
    %c0_30 = arith.constant 0 : index
    %68 = vector.load %arg6[%c8, %c0_30] : memref<32x32xf32, #tpu.memory_space<vmem>>, vector<8x32xf32>
    %cst_31 = arith.constant dense<0.000000e+00> : vector<17x32xf32>
    %69 = tpu.matmul %67, %68, %cst_31 {dimension_numbers = #tpu.dot_dimension_numbers<[1], [0], [0], [1], [0, 0, 1, 1], [], []>} : vector<17x8xf32>, vector<8x32xf32>, vector<17x32xf32> -> vector<17x32xf32>
    %70 = arith.addf %50, %69 : vector<17x32xf32>
    %71 = vector.extract_strided_slice %28 {offsets = [0, 16], sizes = [17, 8], strides = [1, 1]} : vector<17x96xf32> to vector<17x8xf32>
    %cst_32 = arith.constant 0.353553385 : f32
    %72 = vector.broadcast %cst_32 : f32 to vector<17x8xf32>
    %73 = arith.mulf %71, %72 : vector<17x8xf32>
    %74 = vector.extract_strided_slice %28 {offsets = [0, 48], sizes = [17, 8], strides = [1, 1]} : vector<17x96xf32> to vector<17x8xf32>
    %75 = vector.extract_strided_slice %28 {offsets = [0, 80], sizes = [17, 8], strides = [1, 1]} : vector<17x96xf32> to vector<17x8xf32>
    %cst_33 = arith.constant dense<0.000000e+00> : vector<17x17xf32>
    %76 = tpu.matmul %73, %74, %cst_33 {dimension_numbers = #tpu.dot_dimension_numbers<[1], [1], [0], [0], [0, 0, 1, 0], [], []>} : vector<17x8xf32>, vector<17x8xf32>, vector<17x17xf32> -> vector<17x17xf32>
    %cst_34 = arith.constant dense<0xFF800000> : vector<17xf32>
    %77 = vector.multi_reduction <maximumf>, %76, %cst_34 [1] : vector<17x17xf32> to vector<17xf32>
    %78 = vector.shape_cast %77 : vector<17xf32> to vector<17x1xf32>
    %79 = vector.broadcast %78 : vector<17x1xf32> to vector<17x17xf32>
    %80 = arith.subf %76, %79 : vector<17x17xf32>
    %81 = math.exp %80 : vector<17x17xf32>
    %cst_35 = arith.constant dense<0.000000e+00> : vector<17xf32>
    %82 = vector.multi_reduction <add>, %81, %cst_35 [1] : vector<17x17xf32> to vector<17xf32>
    %83 = vector.shape_cast %82 : vector<17xf32> to vector<17x1xf32>
    %84 = tpu.reciprocal %83 {approx = true} : vector<17x1xf32> -> vector<17x1xf32>
    %85 = vector.broadcast %84 : vector<17x1xf32> to vector<17x17xf32>
    %86 = arith.mulf %81, %85 : vector<17x17xf32>
    %cst_36 = arith.constant dense<0.000000e+00> : vector<17x8xf32>
    %87 = tpu.matmul %86, %75, %cst_36 {dimension_numbers = #tpu.dot_dimension_numbers<[1], [0], [0], [1], [0, 0, 1, 1], [], []>} : vector<17x17xf32>, vector<17x8xf32>, vector<17x8xf32> -> vector<17x8xf32>
    %c16 = arith.constant 16 : index
    %c0_37 = arith.constant 0 : index
    %88 = vector.load %arg6[%c16, %c0_37] : memref<32x32xf32, #tpu.memory_space<vmem>>, vector<8x32xf32>
    %cst_38 = arith.constant dense<0.000000e+00> : vector<17x32xf32>
    %89 = tpu.matmul %87, %88, %cst_38 {dimension_numbers = #tpu.dot_dimension_numbers<[1], [0], [0], [1], [0, 0, 1, 1], [], []>} : vector<17x8xf32>, vector<8x32xf32>, vector<17x32xf32> -> vector<17x32xf32>
    %90 = arith.addf %70, %89 : vector<17x32xf32>
    %91 = vector.extract_strided_slice %28 {offsets = [0, 24], sizes = [17, 8], strides = [1, 1]} : vector<17x96xf32> to vector<17x8xf32>
    %cst_39 = arith.constant 0.353553385 : f32
    %92 = vector.broadcast %cst_39 : f32 to vector<17x8xf32>
    %93 = arith.mulf %91, %92 : vector<17x8xf32>
    %94 = vector.extract_strided_slice %28 {offsets = [0, 56], sizes = [17, 8], strides = [1, 1]} : vector<17x96xf32> to vector<17x8xf32>
    %95 = vector.extract_strided_slice %28 {offsets = [0, 88], sizes = [17, 8], strides = [1, 1]} : vector<17x96xf32> to vector<17x8xf32>
    %cst_40 = arith.constant dense<0.000000e+00> : vector<17x17xf32>
    %96 = tpu.matmul %93, %94, %cst_40 {dimension_numbers = #tpu.dot_dimension_numbers<[1], [1], [0], [0], [0, 0, 1, 0], [], []>} : vector<17x8xf32>, vector<17x8xf32>, vector<17x17xf32> -> vector<17x17xf32>
    %cst_41 = arith.constant dense<0xFF800000> : vector<17xf32>
    %97 = vector.multi_reduction <maximumf>, %96, %cst_41 [1] : vector<17x17xf32> to vector<17xf32>
    %98 = vector.shape_cast %97 : vector<17xf32> to vector<17x1xf32>
    %99 = vector.broadcast %98 : vector<17x1xf32> to vector<17x17xf32>
    %100 = arith.subf %96, %99 : vector<17x17xf32>
    %101 = math.exp %100 : vector<17x17xf32>
    %cst_42 = arith.constant dense<0.000000e+00> : vector<17xf32>
    %102 = vector.multi_reduction <add>, %101, %cst_42 [1] : vector<17x17xf32> to vector<17xf32>
    %103 = vector.shape_cast %102 : vector<17xf32> to vector<17x1xf32>
    %104 = tpu.reciprocal %103 {approx = true} : vector<17x1xf32> -> vector<17x1xf32>
    %105 = vector.broadcast %104 : vector<17x1xf32> to vector<17x17xf32>
    %106 = arith.mulf %101, %105 : vector<17x17xf32>
    %cst_43 = arith.constant dense<0.000000e+00> : vector<17x8xf32>
    %107 = tpu.matmul %106, %95, %cst_43 {dimension_numbers = #tpu.dot_dimension_numbers<[1], [0], [0], [1], [0, 0, 1, 1], [], []>} : vector<17x17xf32>, vector<17x8xf32>, vector<17x8xf32> -> vector<17x8xf32>
    %c24 = arith.constant 24 : index
    %c0_44 = arith.constant 0 : index
    %108 = vector.load %arg6[%c24, %c0_44] : memref<32x32xf32, #tpu.memory_space<vmem>>, vector<8x32xf32>
    %cst_45 = arith.constant dense<0.000000e+00> : vector<17x32xf32>
    %109 = tpu.matmul %107, %108, %cst_45 {dimension_numbers = #tpu.dot_dimension_numbers<[1], [0], [0], [1], [0, 0, 1, 1], [], []>} : vector<17x8xf32>, vector<8x32xf32>, vector<17x32xf32> -> vector<17x32xf32>
    %110 = arith.addf %90, %109 : vector<17x32xf32>
    %111 = arith.addf %1, %110 : vector<17x32xf32>
    %cst_46 = arith.constant dense<0.000000e+00> : vector<17xf32>
    %112 = vector.multi_reduction <add>, %111, %cst_46 [1] : vector<17x32xf32> to vector<17xf32>
    %113 = vector.shape_cast %112 : vector<17xf32> to vector<17x1xf32>
    %cst_47 = arith.constant 3.200000e+01 : f32
    %114 = vector.broadcast %cst_47 : f32 to vector<17x1xf32>
    %115 = arith.divf %113, %114 : vector<17x1xf32>
    %116 = vector.broadcast %115 : vector<17x1xf32> to vector<17x32xf32>
    %117 = arith.subf %111, %116 : vector<17x32xf32>
    %118 = arith.mulf %117, %117 : vector<17x32xf32>
    %cst_48 = arith.constant dense<0.000000e+00> : vector<17xf32>
    %119 = vector.multi_reduction <add>, %118, %cst_48 [1] : vector<17x32xf32> to vector<17xf32>
    %120 = vector.shape_cast %119 : vector<17xf32> to vector<17x1xf32>
    %cst_49 = arith.constant 3.200000e+01 : f32
    %121 = vector.broadcast %cst_49 : f32 to vector<17x1xf32>
    %122 = arith.divf %120, %121 : vector<17x1xf32>
    %cst_50 = arith.constant 9.99999997E-7 : f32
    %123 = vector.broadcast %cst_50 : f32 to vector<17x1xf32>
    %124 = arith.addf %122, %123 : vector<17x1xf32>
    %125 = math.rsqrt %124 : vector<17x1xf32>
    %126 = vector.broadcast %125 : vector<17x1xf32> to vector<17x32xf32>
    %127 = arith.mulf %117, %126 : vector<17x32xf32>
    %c0_51 = arith.constant 0 : index
    %c0_52 = arith.constant 0 : index
    %128 = vector.load %arg8[%c0_51, %c0_52] : memref<1x32xf32, #tpu.memory_space<vmem>>, vector<1x32xf32>
    %129 = vector.broadcast %128 : vector<1x32xf32> to vector<17x32xf32>
    %130 = arith.mulf %127, %129 : vector<17x32xf32>
    %c0_53 = arith.constant 0 : index
    %c0_54 = arith.constant 0 : index
    %131 = vector.load %arg9[%c0_53, %c0_54] : memref<1x32xf32, #tpu.memory_space<vmem>>, vector<1x32xf32>
    %132 = vector.broadcast %131 : vector<1x32xf32> to vector<17x32xf32>
    %133 = arith.addf %130, %132 : vector<17x32xf32>
    %c0_55 = arith.constant 0 : index
    %c0_56 = arith.constant 0 : index
    %134 = vector.load %arg10[%c0_55, %c0_56] : memref<32x128xf32, #tpu.memory_space<vmem>>, vector<32x128xf32>
    %cst_57 = arith.constant dense<0.000000e+00> : vector<17x128xf32>
    %135 = tpu.matmul %133, %134, %cst_57 {dimension_numbers = #tpu.dot_dimension_numbers<[1], [0], [0], [1], [0, 0, 1, 1], [], []>} : vector<17x32xf32>, vector<32x128xf32>, vector<17x128xf32> -> vector<17x128xf32>
    %c0_58 = arith.constant 0 : index
    %c0_59 = arith.constant 0 : index
    %136 = vector.load %arg11[%c0_58, %c0_59] : memref<1x128xf32, #tpu.memory_space<vmem>>, vector<1x128xf32>
    %137 = vector.broadcast %136 : vector<1x128xf32> to vector<17x128xf32>
    %138 = arith.addf %135, %137 : vector<17x128xf32>
    %cst_60 = arith.constant 5.000000e-01 : f32
    %139 = vector.broadcast %cst_60 : f32 to vector<17x128xf32>
    %140 = arith.mulf %139, %138 : vector<17x128xf32>
    %cst_61 = arith.constant 0.707106769 : f32
    %141 = vector.broadcast %cst_61 : f32 to vector<17x128xf32>
    %142 = arith.mulf %138, %141 : vector<17x128xf32>
    %143 = math.erf %142 : vector<17x128xf32>
    %cst_62 = arith.constant 1.000000e+00 : f32
    %144 = vector.broadcast %cst_62 : f32 to vector<17x128xf32>
    %145 = arith.addf %144, %143 : vector<17x128xf32>
    %146 = arith.mulf %140, %145 : vector<17x128xf32>
    %c0_63 = arith.constant 0 : index
    %c0_64 = arith.constant 0 : index
    %147 = vector.load %arg12[%c0_63, %c0_64] : memref<128x32xf32, #tpu.memory_space<vmem>>, vector<128x32xf32>
    %cst_65 = arith.constant dense<0.000000e+00> : vector<17x32xf32>
    %148 = tpu.matmul %146, %147, %cst_65 {dimension_numbers = #tpu.dot_dimension_numbers<[1], [0], [0], [1], [0, 0, 1, 1], [], []>} : vector<17x128xf32>, vector<128x32xf32>, vector<17x32xf32> -> vector<17x32xf32>
    %c0_66 = arith.constant 0 : index
    %c0_67 = arith.constant 0 : index
    %149 = vector.load %arg13[%c0_66, %c0_67] : memref<1x32xf32, #tpu.memory_space<vmem>>, vector<1x32xf32>
    %150 = vector.broadcast %149 : vector<1x32xf32> to vector<17x32xf32>
    %151 = arith.addf %148, %150 : vector<17x32xf32>
    %152 = arith.addf %111, %151 : vector<17x32xf32>
    %c0_68 = arith.constant 0 : index
    %c0_69 = arith.constant 0 : index
    %c0_70 = arith.constant 0 : index
    %153 = vector.load %arg14[%c0_68, %c0_69, %c0_70] : memref<1x17x32xf32, #tpu.memory_space<vmem>>, vector<1x17x32xf32>
    %154 = vector.shape_cast %153 : vector<1x17x32xf32> to vector<17x32xf32>
    %155 = vector.shape_cast %152 : vector<17x32xf32> to vector<1x17x32xf32>
    tpu.vector_store %arg14[%c0_68, %c0_69, %c0_70], %155 {strides = array<i32>} : memref<1x17x32xf32, #tpu.memory_space<vmem>>, vector<1x17x32xf32>,
    return
  }
  func.func @transform_0(%arg0: i32) -> (i32, i32, i32) {
    %c0_i32 = arith.constant 0 : i32
    %c0_i32_0 = arith.constant 0 : i32
    %c0_i32_1 = arith.constant 0 : i32
    return %arg0, %c0_i32, %c0_i32_0 : i32, i32, i32
  }
  func.func @transform_1(%arg0: i32) -> (i32, i32) {
    %c0_i32 = arith.constant 0 : i32
    %c0_i32_0 = arith.constant 0 : i32
    %c0_i32_1 = arith.constant 0 : i32
    return %c0_i32, %c0_i32_0 : i32, i32
  }
  func.func @transform_2(%arg0: i32) -> (i32, i32) {
    %c0_i32 = arith.constant 0 : i32
    %c0_i32_0 = arith.constant 0 : i32
    %c0_i32_1 = arith.constant 0 : i32
    return %c0_i32, %c0_i32_0 : i32, i32
  }
  func.func @transform_3(%arg0: i32) -> (i32, i32) {
    %c0_i32 = arith.constant 0 : i32
    %c0_i32_0 = arith.constant 0 : i32
    %c0_i32_1 = arith.constant 0 : i32
    return %c0_i32, %c0_i32_0 : i32, i32
  }
  func.func @transform_4(%arg0: i32) -> (i32, i32) {
    %c0_i32 = arith.constant 0 : i32
    %c0_i32_0 = arith.constant 0 : i32
    %c0_i32_1 = arith.constant 0 : i32
    return %c0_i32, %c0_i32_0 : i32, i32
  }
  func.func @transform_5(%arg0: i32) -> (i32, i32) {
    %c0_i32 = arith.constant 0 : i32
    %c0_i32_0 = arith.constant 0 : i32
    %c0_i32_1 = arith.constant 0 : i32
    return %c0_i32, %c0_i32_0 : i32, i32
  }
  func.func @transform_6(%arg0: i32) -> (i32, i32) {
    %c0_i32 = arith.constant 0 : i32
    %c0_i32_0 = arith.constant 0 : i32
    %c0_i32_1 = arith.constant 0 : i32
    return %c0_i32, %c0_i32_0 : i32, i32
  }
  func.func @transform_7(%arg0: i32) -> (i32, i32) {
    %c0_i32 = arith.constant 0 : i32
    %c0_i32_0 = arith.constant 0 : i32
    %c0_i32_1 = arith.constant 0 : i32
    return %c0_i32, %c0_i32_0 : i32, i32
  }
  func.func @transform_8(%arg0: i32) -> (i32, i32) {
    %c0_i32 = arith.constant 0 : i32
    %c0_i32_0 = arith.constant 0 : i32
    %c0_i32_1 = arith.constant 0 : i32
    return %c0_i32, %c0_i32_0 : i32, i32
  }
  func.func @transform_9(%arg0: i32) -> (i32, i32) {
    %c0_i32 = arith.constant 0 : i32
    %c0_i32_0 = arith.constant 0 : i32
    %c0_i32_1 = arith.constant 0 : i32
    return %c0_i32, %c0_i32_0 : i32, i32
  }
  func.func @transform_10(%arg0: i32) -> (i32, i32) {
    %c0_i32 = arith.constant 0 : i32
    %c0_i32_0 = arith.constant 0 : i32
    %c0_i32_1 = arith.constant 0 : i32
    return %c0_i32, %c0_i32_0 : i32, i32
  }
  func.func @transform_11(%arg0: i32) -> (i32, i32) {
    %c0_i32 = arith.constant 0 : i32
    %c0_i32_0 = arith.constant 0 : i32
    %c0_i32_1 = arith.constant 0 : i32
    return %c0_i32, %c0_i32_0 : i32, i32
  }
  func.func @transform_12(%arg0: i32) -> (i32, i32) {
    %c0_i32 = arith.constant 0 : i32
    %c0_i32_0 = arith.constant 0 : i32
    %c0_i32_1 = arith.constant 0 : i32
    return %c0_i32, %c0_i32_0 : i32, i32
  }
  func.func @transform_13(%arg0: i32) -> (i32, i32, i32) {
    %c0_i32 = arith.constant 0 : i32
    %c0_i32_0 = arith.constant 0 : i32
    %c0_i32_1 = arith.constant 0 : i32
    return %arg0, %c0_i32, %c0_i32_0 : i32, i32, i32
  }
}

</mosaic_0001>

<bundles_post_ra>
// kernel: encoder_block.1
= control target key start
LH: loop header
LB: loop body
LE: loop exit
PB: predicated region body
PF: predicated region fallthrough
CT: control target
= control target key end

     0   :  { %s1901_s25 = smov 0   ;;  %s2294_s0 = inlined_call_operand.vmem [shape: f32[2,17,32], index: 0, kind: input, shape index: {}]   ;;  %s2295_s1 = inlined_call_operand.vmem [shape: f32[1,32], index: 1, kind: input, shape index: {}]   ;;  %s2296_s2 = inlined_call_operand.vmem [shape: f32[1,32], index: 2, kind: input, shape index: {}]   ;;  %s2297_s3 = inlined_call_operand.vmem [shape: f32[32,96], index: 3, kind: input, shape index: {}]   ;;  %s2298_s4 = inlined_call_operand.vmem [shape: f32[1,96], index: 4, kind: input, shape index: {}]   ;;  %s2299_s5 = inlined_call_operand.vmem [shape: f32[32,32], index: 5, kind: input, shape index: {}]   ;;  %s2300_s6 = inlined_call_operand.vmem [shape: f32[1,32], index: 6, kind: input, shape index: {}]   ;;  %s2301_s7 = inlined_call_operand.vmem [shape: f32[1,32], index: 7, kind: input, shape index: {}]   ;;  %s2302_s8 = inlined_call_operand.vmem [shape: f32[1,32], index: 8, kind: input, shape index: {}]   ;;  %s2303_s9 = inlined_call_operand.vmem [shape: f32[32,128], index: 9, kind: input, shape index: {}]   ;;  %s2304_s10 = inlined_call_operand.vmem [shape: f32[1,128], index: 10, kind: input, shape index: {}]   ;;  %s2305_s11 = inlined_call_operand.vmem [shape: f32[128,32], index: 11, kind: input, shape index: {}]   ;;  %s2306_s12 = inlined_call_operand.vmem [shape: f32[1,32], index: 12, kind: input, shape index: {}]   ;;  %s2307_s13 = inlined_call_operand.vmem [shape: f32[2,17,32], index: 13, kind: output, shape index: {}]  }
   0x1 LB: > { %s1620_s26 = sadd.s32 4294967295, %s1817_s25   ;;  %p1624_p0 = scmp.ge.s32.totalorder %s1817_s25, 1  ;;  %s1817_s25 = sphi %s1901_s25, %s23_s25  }
   0x2   : > { %p387_p1 = scmp.lt.s32.totalorder %s1817_s25, 3 }
   0x4   : > { %p388_p2 = pnand %p1624_p0, %p387_p1 }
   0x5   : > { %p431_p3 = scmp.lt.s32.totalorder (!%p388_p2), %s1620_s26, 1  ;;  %s1820_s14 = smov (!%p388_p2), 96  }
   0x6   : > { %391 = sbr.rel (%p388_p2) target bundleno = 2912 (0xb60), region = 72  ;;  %s1821_s15 = smov (!%p388_p2), 64  }
   0x7   : > { %s1822_s16 = smov (!%p388_p2), 88   ;;  %s1823_s17 = smov (!%p388_p2), 120  }
   0x8   : > { %s1824_s20 = smov (!%p388_p2), 56   ;;  %s1825_s21 = smov (!%p388_p2), 80  }
   0x9   : > { %s1826_s22 = smov (!%p388_p2), 72   ;;  %s1827_s23 = smov (!%p388_p2), 112  }
   0xa   : > { %s1828_s24 = smov (!%p388_p2), 104  }
   0xb   : > { %s2309_s26 = smov (!%p431_p3, %s1620_s26), 1  ;;  %vm444_vm0 = vcmask 261120   ;;  %vm451_vm1 = vcmask 253952   ;;  %v1819_v6 = vmov 32.0   ;;  %v536_v28 = vld [vmem:[%s2297_s3 + $0x18] sm:$0xff]  ;;  %v535_v29 = vld [vmem:[%s2297_s3 + $0x10] sm:$0xff] }
   0xc   : > { %s1694_s27 = smul.u32 24, %s2309_s26  ;;  %1743 = vrcp.f32 %v1819_v6  ;;  %1690 = vmatpush.msra.mxu1 %v536_v28  ;;  %562 = vmatpush.msra.mxu0 %v536_v28  ;;  %v534_v30 = vld [vmem:[%s2297_s3 + $0x8] sm:$0xff]  ;;  %v533_v31 = vld [vmem:[%s2297_s3] sm:$0xff]  ;;  %vm589_vm12 = vcmask 64512   ;;  %vm631_vm13 = vcmask 138240   ;;  %vm638_vm14 = vcmask 131072  }
   0xd   : > { %v1735_v49 = vld [vmem:[%s2295_s1] ss:$0 sm:$0xff]  ;;  %vm683_vm15 = vcmask 1040384  }
   0xe   : > { %s435_s30 = scalar_lea.vmem %s2294_s0, %s1694_s27  ;;  %1691 = vmatpush.msra.mxu1 %v535_v29  ;;  %563 = vmatpush.msra.mxu0 %v535_v29  ;;  %v1736_v53 = vld [vmem:[%s2296_s2] ss:$0 sm:$0xff] }
   0xf   : > { %v1917_v0 = vld [vmem:[%s435_s30 + $0x8] sm:$0xff]  ;;  %v1919_v1 = vld [vmem:[%s435_s30] sm:$0xff]  ;;  %v1925_v4 = vld [vmem:[%s435_s30 + $0x10] sm:$0x1]  ;;  %s1829_s30 = smov 48  }
  0x10   : > { %v448_v2 = vsel %vm444_vm0, %v1917_v0, 0.0  ;;  %v445_v3 = vsel %vm444_vm0, %v1919_v1, 0.0  ;;  %v452_v5 = vsel %vm451_vm1, %v1925_v4, 0.0  ;;  %1692 = vmatpush.msra.mxu1 %v534_v30  ;;  %564 = vmatpush.msra.mxu0 %v534_v30 }
  0x11   : > { %449 = vadd.xlane.f32.xlu0 %v448_v2  ;;  %446 = vadd.xlane.f32.xlu1 %v445_v3 }
  0x12   : > { %v1744_v7 = vpop.eup %1743  ;;  %1693 = vmatpush.msra.mxu1 %v533_v31  ;;  %565 = vmatpush.msra.mxu0 %v533_v31 }
  0x13   : > { %v456_v8 = vmul.f32 32.0, %v1744_v7  ;;  %vm460_vm2 = vweird.f32 %v1744_v7 }
  0x15   : > { %v457_v9 = vsub.f32 1.0, %v456_v8 }
  0x17   : > { %v458_v10 = vmul.f32 %v1744_v7, %v457_v9 }
  0x19   : > { %453 = vadd.xlane.f32.xlu0 %v452_v5  ;;  %v459_v11 = vadd.f32 %v1744_v7, %v458_v10 }
  0x1b   : > { %v1929_v12 = vsel %vm460_vm2, %v1744_v7, %v459_v11 }
  0x84   : > { %v450_v13 = vpop.xlane.xlu0 %449  ;;  %v447_v17 = vpop.xlane.xlu1 %446 }
  0x85   : > { %v463_v14 = vmul.f32 %v1929_v12, %v450_v13  ;;  %v462_v21 = vmul.f32 %v1929_v12, %v447_v17  ;;  %v1737_v13 = vld [vmem:[%s2298_s4] ss:$0 sm:$0xff] }
  0x87   : > { %v466_v15 = vsub.f32 %v1917_v0, %v463_v14  ;;  %v1938_v24 = vsub.f32 %v1919_v1, %v462_v21 }
  0x89   : > { %v469_v16 = vmul.f32 %v466_v15, %v466_v15  ;;  %v468_v26 = vmul.f32 %v1938_v24, %v1938_v24 }
  0x8b   : > { %v474_v18 = vsel %vm444_vm0, %v469_v16, 0.0  ;;  %v471_v27 = vsel %vm444_vm0, %v468_v26, 0.0 }
  0x8c   : > { %v454_v19 = vpop.xlane.xlu0 %453  ;;  %475 = vadd.xlane.f32.xlu1 %v474_v18 }
  0x8d   : > { %v464_v20 = vmul.f32 %v1929_v12, %v454_v19 }
  0x8f   : > { %v467_v22 = vsub.f32 %v1925_v4, %v464_v20 }
  0x91   : > { %v470_v23 = vmul.f32 %v467_v22, %v467_v22 }
  0x93   : > { %v477_v25 = vsel %vm451_vm1, %v470_v23, 0.0 }
  0x94   : > { %478 = vadd.xlane.f32.xlu2 %v477_v25 }
  0x9c   : > { %472 = vadd.xlane.f32.xlu2 %v471_v27 }
  0xff   : > { %v476_v32 = vpop.xlane.xlu1 %475 }
 0x100   : > { %v481_v33 = vmul.f32 %v476_v32, %v1929_v12 }
 0x102   : > { %v484_v34 = vadd.f32 1e-06, %v481_v33 }
 0x104   : > { %1745 = vrsqrt.f32 %v484_v34  ;;  %vm502_vm4 = vweird.f32 %v484_v34 }
 0x107   : > { %v479_v35 = vpop.xlane.xlu2 %478 }
 0x108   : > { %v482_v36 = vmul.f32 %v479_v35, %v1929_v12 }
 0x10a   : > { %v1746_v37 = vpop.eup %1745  ;;  %v485_v38 = vadd.f32 1e-06, %v482_v36 }
 0x10b   : > { %v497_v39 = vmul.f32 %v1746_v37, %v484_v34  ;;  %vm503_vm3 = vweird.f32 %v1746_v37 }
 0x10c   : > { %1747 = vrsqrt.f32 %v485_v38  ;;  %vm504_vm5 = vmor %vm502_vm4, %vm503_vm3  ;;  %vm512_vm7 = vweird.f32 %v485_v38 }
 0x10d   : > { %v498_v40 = vmul.f32 %v1746_v37, %v497_v39 }
 0x10f   : > { %v499_v41 = vmul.f32 0.5, %v498_v40  ;;  %v473_v42 = vpop.xlane.xlu2 %472 }
 0x110   : > { %v480_v43 = vmul.f32 %v473_v42, %v1929_v12 }
 0x111   : > { %v500_v44 = vsub.f32 1.5, %v499_v41 }
 0x112   : > { %v1748_v45 = vpop.eup %1747  ;;  %v483_v46 = vadd.f32 1e-06, %v480_v43 }
 0x113   : > { %v501_v47 = vmul.f32 %v1746_v37, %v500_v44  ;;  %v507_v48 = vmul.f32 %v1748_v45, %v485_v38  ;;  %vm513_vm6 = vweird.f32 %v1748_v45 }
 0x114   : > { %1749 = vrsqrt.f32 %v483_v46  ;;  %vm514_vm8 = vmor %vm512_vm7, %vm513_vm6  ;;  %vm492_vm9 = vweird.f32 %v483_v46 }
 0x115   : > { %v505_v50 = vsel %vm504_vm5, %v1746_v37, %v501_v47  ;;  %v508_v51 = vmul.f32 %v1748_v45, %v507_v48 }
 0x116   : > { %v517_v52 = vmul.f32 %v505_v50, %v466_v15 }
 0x117   : > { %v509_v54 = vmul.f32 0.5, %v508_v51 }
 0x118   : > { %v524_v55 = vmul.f32 %v1735_v49, %v517_v52  ;;  %v712_v52 = vld [vmem:[%s2299_s5] sm:$0xff] }
 0x119   : > { %v510_v56 = vsub.f32 1.5, %v509_v54  ;;  %737 = vmatpush.msra.mxu3 %v712_v52 }
 0x11a   : > { %v1750_v57 = vpop.eup %1749  ;;  %v531_v58 = vadd.f32 %v1736_v53, %v524_v55 }
 0x11b   : > { %v511_v59 = vmul.f32 %v1748_v45, %v510_v56  ;;  %v487_v60 = vmul.f32 %v1750_v57, %v483_v46  ;;  %vm493_vm10 = vweird.f32 %v1750_v57 }
 0x11c   : > { %1628 = vmatmul.msk.f32.vlgmr.msra.gmra.mxu1 %vm444_vm0, %v531_v58  ;;  %vm494_vm11 = vmor %vm492_vm9, %vm493_vm10 }
 0x11d   : > { %v515_v61 = vsel %vm514_vm8, %v1748_v45, %v511_v59  ;;  %v488_v62 = vmul.f32 %v1750_v57, %v487_v60 }
 0x11e   : > { %v518_v63 = vmul.f32 %v515_v61, %v467_v22 }
 0x11f   : > { %v489_v2 = vmul.f32 0.5, %v488_v62 }
 0x120   : > { %v525_v3 = vmul.f32 %v1735_v49, %v518_v63 }
 0x121   : > { %v490_v5 = vsub.f32 1.5, %v489_v2 }
 0x122   : > { %v532_v6 = vadd.f32 %v1736_v53, %v525_v3 }
 0x123   : > { %v491_v7 = vmul.f32 %v1750_v57, %v490_v5 }
 0x124   : > { %1629 = vmatmul.msk.f32.gmra.mxu1 %vm444_vm0, %v532_v6 }
 0x125   : > { %v495_v8 = vsel %vm494_vm11, %v1750_v57, %v491_v7 }
 0x126   : > { %v516_v9 = vmul.f32 %v495_v8, %v1938_v24 }
 0x128   : > { %v523_v10 = vmul.f32 %v1735_v49, %v516_v9 }
 0x12a   : > { %v530_v11 = vadd.f32 %v1736_v53, %v523_v10 }
 0x12c   : > { %1627 = vmatmul.msk.f32.vlgmr.msra.gmra.mxu0 %vm444_vm0, %v530_v11 }
 0x199   : > { %v570_v14 = vpop.f32.mrf.mxu1 }
 0x19a   : > { %v1972_v15 = vadd.f32 %v1737_v13, %v570_v14 }
 0x19c   : > { %585 = vrot.lane.b32.xlu1 %v1972_v15, %s1820_s14  ;;  %v1990_v24 = vmul.f32 0.35355338, %v1972_v15 }
 0x1a1   : > { %v573_v16 = vpop.f32.mrf.mxu1 }
 0x1a2   : > { %v1975_v17 = vadd.f32 %v1737_v13, %v573_v16 }
 0x1a4   : > { %587 = vrot.lane.b32.xlu0 %v1975_v17, %s1820_s14  ;;  %v1995_v25 = vmul.f32 0.35355338, %v1975_v17 }
 0x1a9   : > { %v567_v18 = vpop.f32.mrf.mxu0 }
 0x1aa   : > { %v1978_v19 = vadd.f32 %v1737_v13, %v567_v18 }
 0x1ac   : > { %583 = vrot.lane.b32.xlu2 %v1978_v19, %s1820_s14  ;;  %v1985_v23 = vmul.f32 0.35355338, %v1978_v19  ;;  %v2005_v32 = vpack.i.bf16 %v1978_v19, %v1972_v15 }
 0x206   : > { %v584_v22 = vpop.permute.xlu2 %583 }
 0x20e   : > { %v586_v21 = vpop.permute.xlu1 %585 }
 0x216   : > { %v588_v20 = vpop.permute.xlu0 %587 }
 0x217   : > { %1630 = vmatpush.xpose.msk.msrb.mxu1 %vm589_vm12, %v588_v20 }
 0x21b   : > { %1631 = vmatpush.xpose.msk.msrb.mxu1 %vm589_vm12, %v586_v21 }
 0x21f   : > { %1632 = vmatpush.xpose.msk.msrb.mxu1 %vm589_vm12, %v584_v22 }
 0x222   : > { %1633 = vmatmul.msk.f32.vlgmr.msrb.gmra.mxu1 %vm589_vm12, %v1985_v23 }
 0x22a   : > { %1634 = vmatmul.msk.f32.gmra.mxu1 %vm589_vm12, %v1990_v24 }
 0x232   : > { %1635 = vmatmul.msk.f32.gmra.mxu1 %vm589_vm12, %v1995_v25 }
 0x29f   : > { %v622_v26 = vpop.f32.mrf.mxu1 }
 0x2a0   : > { %v632_v27 = vsel %vm631_vm13, %v622_v26, -inf }
 0x2a1   : > { %633 = vmax.xlane.f32.xlu0 %v632_v27 }
 0x2a7   : > { %v625_v28 = vpop.f32.mrf.mxu1 }
 0x2a8   : > { %v635_v29 = vsel %vm631_vm13, %v625_v28, -inf }
 0x2a9   : > { %636 = vmax.xlane.f32.xlu2 %v635_v29 }
 0x2af   : > { %v628_v30 = vpop.f32.mrf.mxu1 }
 0x2b0   : > { %v639_v31 = vsel %vm638_vm14, %v628_v30, -inf }
 0x2b1   : > { %640 = vmax.xlane.f32.xlu1 %v639_v31 }
 0x2c1   : > { %670 = vrot.lane.b32.xlu2 %v1975_v17, %s1821_s15 }
 0x2c9   : > { %762 = vrot.lane.b32.xlu2 %v1972_v15, %s1822_s16 }
 0x2ca   : > { %1716 = vrot.lane.b32.xlu1 %v2005_v32, %s1821_s15  ;;  %s440_s15 = scalar_lea.vmem %s2307_s13, %s1694_s27 }
 0x2d1   : > { %754 = vrot.lane.b32.xlu2 %v1985_v23, %s1823_s17 }
 0x2d2   : > { %760 = vrot.lane.b32.xlu1 %v1978_v19, %s1822_s16 }
 0x2d9   : > { %758 = vrot.lane.b32.xlu2 %v1995_v25, %s1823_s17 }
 0x2da   : > { %756 = vrot.lane.b32.xlu1 %v1990_v24, %s1823_s17 }
 0x314   : > { %v634_v33 = vpop.xlane.xlu0 %633 }
 0x315   : > { %v642_v34 = vsub.f32 %v622_v26, %v634_v33 }
 0x317   : > { %v645_v35 = vmul.f32 1.442695, %v642_v34 }
 0x319   : > { %1751 = vpow2.f32 %v645_v35 }
 0x31c   : > { %v637_v36 = vpop.xlane.xlu2 %636 }
 0x31d   : > { %v643_v37 = vsub.f32 %v625_v28, %v637_v36 }
 0x31f   : > { %v1752_v38 = vpop.eup %1751  ;;  %v647_v39 = vmul.f32 1.442695, %v643_v37 }
 0x320   : > { %v651_v40 = vsel %vm631_vm13, %v1752_v38, 0.0 }
 0x321   : > { %1753 = vpow2.f32 %v647_v39  ;;  %652 = vadd.xlane.f32.xlu0 %v651_v40 }
 0x324   : > { %v671_v41 = vpop.permute.xlu2 %670  ;;  %v641_v42 = vpop.xlane.xlu1 %640 }
 0x325   : > { %v644_v43 = vsub.f32 %v628_v30, %v641_v42  ;;  %1636 = vmatpush.msk.msra.mxu2 %vm683_vm15, %v671_v41  ;;  %v882_v30 = vld [vmem:[%s2299_s5 + $0x8] sm:$0xff] }
 0x326   : > { %907 = vmatpush.msrb.mxu0 %v882_v30 }
 0x327   : > { %v1754_v44 = vpop.eup %1753  ;;  %v649_v45 = vmul.f32 1.442695, %v644_v43 }
 0x328   : > { %v654_v46 = vsel %vm631_vm13, %v1754_v44, 0.0 }
 0x329   : > { %1755 = vpow2.f32 %v649_v45  ;;  %655 = vadd.xlane.f32.xlu0 %v654_v46 }
 0x32c   : > { %v763_v63 = vpop.permute.xlu2 %762 }
 0x32f   : > { %v1756_v47 = vpop.eup %1755 }
 0x330   : > { %v657_v48 = vsel %vm638_vm14, %v1756_v47, 0.0 }
 0x331   : > { %658 = vadd.xlane.f32.xlu0 %v657_v48 }
 0x334   : > { %v755_v7 = vpop.permute.xlu2 %754 }
 0x33c   : > { %v1717_v49 = vpop.permute.xlu1 %1716  ;;  %v759_v9 = vpop.permute.xlu2 %758 }
 0x33d   : > { %v1718_v50 = vunpack.i.l.bf16 %v1717_v49  ;;  %v1719_v51 = vunpack.i.h.bf16 %v1717_v49 }
 0x33f   : > { %700 = vmatpush.msra.mxu2 %v1718_v50 }
 0x341   : > { %701 = vmatpush.msra.mxu2 %v1719_v51 }
 0x344   : > { %v761_v2 = vpop.permute.xlu1 %760 }
 0x345   : > { %764 = vrot.lane.b32.xlu0 %v1975_v17, %s1822_s16  ;;  %s1830_s16 = smov 40  }
 0x34c   : > { %v757_v8 = vpop.permute.xlu1 %756 }
 0x394   : > { %v653_v53 = vpop.xlane.xlu0 %652 }
 0x395   : > { %1757 = vrcp.f32 %v653_v53 }
 0x39b   : > { %v1758_v54 = vpop.eup %1757 }
 0x39c   : > { %v656_v55 = vpop.xlane.xlu0 %655  ;;  %v663_v56 = vmul.f32 %v1758_v54, %v1752_v38 }
 0x39d   : > { %1759 = vrcp.f32 %v656_v55 }
 0x39e   : > { %1637 = vmatmul.msk.f32.vlgmr.msra.gmra.mxu2 %vm631_vm13, %v663_v56 }
 0x3a3   : > { %v1760_v57 = vpop.eup %1759 }
 0x3a4   : > { %v659_v58 = vpop.xlane.xlu0 %658  ;;  %v664_v59 = vmul.f32 %v1760_v57, %v1754_v44 }
 0x3a5   : > { %1761 = vrcp.f32 %v659_v58 }
 0x3a6   : > { %1638 = vmatmul.msk.f32.gmra.mxu2 %vm631_vm13, %v664_v59 }
 0x3ab   : > { %v1762_v60 = vpop.eup %1761 }
 0x3ac   : > { %v665_v61 = vmul.f32 %v1762_v60, %v1756_v47 }
 0x3ae   : > { %1639 = vmatmul.msk.f32.gmra.mxu2 %vm631_vm13, %v665_v61 }
 0x3b7   : > { %v765_v62 = vpop.permute.xlu0 %764 }
 0x3b8   : > { %1643 = vmatpush.xpose.msk.msrb.mxu3 %vm589_vm12, %v765_v62 }
 0x3bc   : > { %1644 = vmatpush.xpose.msk.msrb.mxu3 %vm589_vm12, %v763_v63 }
 0x3c0   : > { %1645 = vmatpush.xpose.msk.msrb.mxu3 %vm589_vm12, %v761_v2 }
 0x421   : > { %v703_v3 = vpop.f32.mrf.mxu2 }
 0x422   : > { %1640 = vmatmul.msk.f32.vlgmr.msra.gmra.mxu3 %vm589_vm12, %v703_v3 }
 0x429   : > { %v706_v5 = vpop.f32.mrf.mxu2 }
 0x42a   : > { %1641 = vmatmul.msk.f32.gmra.mxu3 %vm589_vm12, %v706_v5 }
 0x431   : > { %v709_v6 = vpop.f32.mrf.mxu2 }
 0x432   : > { %1642 = vmatmul.msk.f32.gmra.mxu3 %vm589_vm12, %v709_v6 }
 0x43a   : > { %1646 = vmatmul.msk.f32.vlgmr.msrb.gmra.mxu3 %vm589_vm12, %v755_v7 }
 0x442   : > { %1647 = vmatmul.msk.f32.gmra.mxu3 %vm589_vm12, %v757_v8 }
 0x44a   : > { %1648 = vmatmul.msk.f32.gmra.mxu3 %vm589_vm12, %v759_v9 }
 0x4a5   : > { %v2036_v10 = vpop.f32.mrf.mxu3 }
 0x4ad   : > { %v2038_v11 = vpop.f32.mrf.mxu3 }
 0x4b5   : > { %v2040_v13 = vpop.f32.mrf.mxu3 }
 0x4bd   : > { %v795_v14 = vpop.f32.mrf.mxu3 }
 0x4be   : > { %v804_v16 = vsel %vm631_vm13, %v795_v14, -inf }
 0x4bf   : > { %805 = vmax.xlane.f32.xlu0 %v804_v16  ;;  %v1738_v16 = vld [vmem:[%s2300_s6] ss:$0 sm:$0xff] }
 0x4c5   : > { %v798_v18 = vpop.f32.mrf.mxu3 }
 0x4c6   : > { %v807_v20 = vsel %vm631_vm13, %v798_v18, -inf }
 0x4c7   : > { %808 = vmax.xlane.f32.xlu1 %v807_v20 }
 0x4cd   : > { %v801_v21 = vpop.f32.mrf.mxu3 }
 0x4ce   : > { %v810_v22 = vsel %vm638_vm14, %v801_v21, -inf }
 0x4cf   : > { %811 = vmax.xlane.f32.xlu2 %v810_v22  ;;  %v752_v22 = vadd.f32 %v1738_v16, %v2038_v11 }
 0x4e0   : > { %841 = vrot.lane.b32.xlu1 %v1975_v17, %s1824_s20 }
 0x4e7   : > { %1721 = vrot.lane.b32.xlu2 %v2005_v32, %s1824_s20 }
 0x4e8   : > { %929 = vrot.lane.b32.xlu1 %v1972_v15, %s1825_s21 }
 0x4ef   : > { %927 = vrot.lane.b32.xlu2 %v1978_v19, %s1825_s21 }
 0x4f0   : > { %1098 = vrot.lane.b32.xlu1 %v1975_v17, %s1826_s22 }
 0x4f7   : > { %921 = vrot.lane.b32.xlu2 %v1985_v23, %s1827_s23 }
 0x4f8   : > { %1096 = vrot.lane.b32.xlu1 %v1972_v15, %s1826_s22 }
 0x4ff   : > { %923 = vrot.lane.b32.xlu2 %v1990_v24, %s1827_s23 }
 0x500   : > { %1088 = vrot.lane.b32.xlu1 %v1985_v23, %s1828_s24 }
 0x507   : > { %1090 = vrot.lane.b32.xlu2 %v1990_v24, %s1828_s24 }
 0x508   : > { %1092 = vrot.lane.b32.xlu1 %v1995_v25, %s1828_s24 }
 0x532   : > { %v806_v26 = vpop.xlane.xlu0 %805 }
 0x533   : > { %v813_v27 = vsub.f32 %v795_v14, %v806_v26 }
 0x535   : > { %v816_v28 = vmul.f32 1.442695, %v813_v27 }
 0x537   : > { %1763 = vpow2.f32 %v816_v28  ;;  %v753_v28 = vadd.f32 %v1738_v16, %v2040_v13 }
 0x53a   : > { %v809_v29 = vpop.xlane.xlu1 %808 }
 0x53b   : > { %v814_v15 = vsub.f32 %v798_v18, %v809_v29  ;;  %v751_v18 = vadd.f32 %v1738_v16, %v2036_v10 }
 0x53d   : > { %v1764_v31 = vpop.eup %1763  ;;  %v818_v33 = vmul.f32 1.442695, %v814_v15 }
 0x53e   : > { %v822_v34 = vsel %vm631_vm13, %v1764_v31, 0.0 }
 0x53f   : > { %1765 = vpow2.f32 %v818_v33  ;;  %823 = vadd.xlane.f32.xlu0 %v822_v34 }
 0x542   : > { %v812_v23 = vpop.xlane.xlu2 %811 }
 0x543   : > { %v815_v24 = vsub.f32 %v801_v21, %v812_v23 }
 0x545   : > { %v1766_v35 = vpop.eup %1765  ;;  %v820_v36 = vmul.f32 1.442695, %v815_v24 }
 0x546   : > { %v825_v37 = vsel %vm631_vm13, %v1766_v35, 0.0 }
 0x547   : > { %1767 = vpow2.f32 %v820_v36  ;;  %826 = vadd.xlane.f32.xlu0 %v825_v37 }
 0x54a   : > { %v1722_v40 = vpop.permute.xlu2 %1721 }
 0x54b   : > { %v1723_v42 = vunpack.i.l.bf16 %v1722_v40  ;;  %v1724_v43 = vunpack.i.h.bf16 %v1722_v40 }
 0x54d   : > { %v1768_v38 = vpop.eup %1767 }
 0x54e   : > { %v828_v39 = vsel %vm638_vm14, %v1768_v38, 0.0 }
 0x54f   : > { %829 = vadd.xlane.f32.xlu0 %v828_v39 }
 0x552   : > { %v842_v41 = vpop.permute.xlu1 %841 }
 0x553   : > { %1649 = vmatpush.msk.msrb.mxu2 %vm683_vm15, %v842_v41 }
 0x555   : > { %870 = vmatpush.msrb.mxu2 %v1723_v42 }
 0x557   : > { %871 = vmatpush.msrb.mxu2 %v1724_v43 }
 0x55a   : > { %v930_v44 = vpop.permute.xlu1 %929 }
 0x562   : > { %v1099_v45 = vpop.permute.xlu1 %1098 }
 0x563   : > { %1669 = vmatpush.xpose.msk.msra.mxu0 %vm589_vm12, %v1099_v45  ;;  %931 = vrot.lane.b32.xlu0 %v1975_v17, %s1825_s21 }
 0x56a   : > { %v1097_v46 = vpop.permute.xlu1 %1096 }
 0x56b   : > { %1670 = vmatpush.xpose.msk.msra.mxu0 %vm589_vm12, %v1097_v46  ;;  %1094 = vrot.lane.b32.xlu0 %v1978_v19, %s1826_s22  ;;  %v928_v19 = vpop.permute.xlu2 %927 }
 0x572   : > { %v1089_v63 = vpop.permute.xlu1 %1088 }
 0x573   : > { %925 = vrot.lane.b32.xlu0 %v1995_v25, %s1827_s23  ;;  %v922_v57 = vpop.permute.xlu2 %921 }
 0x57a   : > { %v1093_v7 = vpop.permute.xlu1 %1092 }
 0x57b   : > { %v924_v58 = vpop.permute.xlu2 %923 }
 0x583   : > { %v1091_v3 = vpop.permute.xlu2 %1090 }
 0x5b2   : > { %v824_v47 = vpop.xlane.xlu0 %823 }
 0x5b3   : > { %1769 = vrcp.f32 %v824_v47 }
 0x5b9   : > { %v1770_v48 = vpop.eup %1769 }
 0x5ba   : > { %v827_v49 = vpop.xlane.xlu0 %826  ;;  %v834_v50 = vmul.f32 %v1770_v48, %v1764_v31 }
 0x5bb   : > { %1771 = vrcp.f32 %v827_v49 }
 0x5bc   : > { %1650 = vmatmul.msk.f32.vlgmr.msrb.gmra.mxu2 %vm631_vm13, %v834_v50 }
 0x5c1   : > { %v1772_v51 = vpop.eup %1771 }
 0x5c2   : > { %v830_v52 = vpop.xlane.xlu0 %829  ;;  %v835_v53 = vmul.f32 %v1772_v51, %v1766_v35 }
 0x5c3   : > { %1773 = vrcp.f32 %v830_v52 }
 0x5c4   : > { %1651 = vmatmul.msk.f32.gmra.mxu2 %vm631_vm13, %v835_v53 }
 0x5c9   : > { %v1774_v54 = vpop.eup %1773 }
 0x5ca   : > { %v836_v55 = vmul.f32 %v1774_v54, %v1768_v38 }
 0x5cc   : > { %1652 = vmatmul.msk.f32.gmra.mxu2 %vm631_vm13, %v836_v55 }
 0x5d5   : > { %v932_v25 = vpop.permute.xlu0 %931 }
 0x5d6   : > { %1656 = vmatpush.xpose.msk.msra.mxu1 %vm589_vm12, %v932_v25 }
 0x5da   : > { %1657 = vmatpush.xpose.msk.msra.mxu1 %vm589_vm12, %v930_v44 }
 0x5dd   : > { %v1095_v56 = vpop.permute.xlu0 %1094 }
 0x5de   : > { %1658 = vmatpush.xpose.msk.msra.mxu1 %vm589_vm12, %v928_v19  ;;  %1671 = vmatpush.xpose.msk.msra.mxu0 %vm589_vm12, %v1095_v56 }
 0x5e1   : > { %1659 = vmatmul.msk.f32.vlgmr.msra.gmra.mxu1 %vm589_vm12, %v922_v57 }
 0x5e5   : > { %v926_v59 = vpop.permute.xlu0 %925 }
 0x5e9   : > { %1660 = vmatmul.msk.f32.gmra.mxu1 %vm589_vm12, %v924_v58 }
 0x5f1   : > { %1661 = vmatmul.msk.f32.gmra.mxu1 %vm589_vm12, %v926_v59 }
 0x63f   : > { %v873_v60 = vpop.f32.mrf.mxu2 }
 0x640   : > { %1653 = vmatmul.msk.f32.vlgmr.msrb.gmra.mxu0 %vm589_vm12, %v873_v60 }
 0x647   : > { %v876_v61 = vpop.f32.mrf.mxu2 }
 0x648   : > { %1654 = vmatmul.msk.f32.gmra.mxu0 %vm589_vm12, %v876_v61 }
 0x64f   : > { %v879_v62 = vpop.f32.mrf.mxu2 }
 0x650   : > { %1655 = vmatmul.msk.f32.gmra.mxu0 %vm589_vm12, %v879_v62 }
 0x658   : > { %1672 = vmatmul.msk.f32.vlgmr.msra.gmra.mxu0 %vm589_vm12, %v1089_v63 }
 0x65e   : > { %v962_v2 = vpop.f32.mrf.mxu1 }
 0x65f   : > { %v971_v5 = vsel %vm631_vm13, %v962_v2, -inf }
 0x660   : > { %972 = vmax.xlane.f32.xlu0 %v971_v5  ;;  %1673 = vmatmul.msk.f32.gmra.mxu0 %vm589_vm12, %v1091_v3 }
 0x666   : > { %v965_v6 = vpop.f32.mrf.mxu1 }
 0x667   : > { %v974_v8 = vsel %vm631_vm13, %v965_v6, -inf }
 0x668   : > { %975 = vmax.xlane.f32.xlu2 %v974_v8  ;;  %1674 = vmatmul.msk.f32.gmra.mxu0 %vm589_vm12, %v1093_v7 }
 0x66e   : > { %v968_v9 = vpop.f32.mrf.mxu1 }
 0x66f   : > { %v977_v14 = vsel %vm638_vm14, %v968_v9, -inf }
 0x670   : > { %978 = vmax.xlane.f32.xlu0 %v977_v14 }
 0x680   : > { %1008 = vrot.lane.b32.xlu2 %v1975_v17, %s1829_s30 }
 0x6bd   : > { %v909_v20 = vpop.f32.mrf.mxu0 }
 0x6be   : > { %v2102_v21 = vadd.f32 %v909_v20, %v751_v18  ;;  %v1049_v18 = vld [vmem:[%s2299_s5 + $0x10] sm:$0xff] }
 0x6bf   : > { %1074 = vmatpush.msra.mxu2 %v1049_v18 }
 0x6c5   : > { %v912_v26 = vpop.f32.mrf.mxu0 }
 0x6c6   : > { %v2105_v27 = vadd.f32 %v912_v26, %v752_v22 }
 0x6cd   : > { %v915_v29 = vpop.f32.mrf.mxu0 }
 0x6ce   : > { %v2108_v30 = vadd.f32 %v915_v29, %v753_v28 }
 0x6d3   : > { %v973_v15 = vpop.xlane.xlu0 %972 }
 0x6d4   : > { %v980_v31 = vsub.f32 %v962_v2, %v973_v15 }
 0x6d5   : > { %v1129_v33 = vpop.f32.mrf.mxu0 }
 0x6d6   : > { %v983_v34 = vmul.f32 1.442695, %v980_v31  ;;  %v1138_v23 = vsel %vm631_vm13, %v1129_v33, -inf }
 0x6d7   : > { %1139 = vmax.xlane.f32.xlu1 %v1138_v23 }
 0x6d8   : > { %1775 = vpow2.f32 %v983_v34 }
 0x6db   : > { %v976_v10 = vpop.xlane.xlu2 %975 }
 0x6dc   : > { %v981_v24 = vsub.f32 %v965_v6, %v976_v10 }
 0x6dd   : > { %v1132_v35 = vpop.f32.mrf.mxu0 }
 0x6de   : > { %v1776_v11 = vpop.eup %1775  ;;  %v985_v36 = vmul.f32 1.442695, %v981_v24  ;;  %v1141_v37 = vsel %vm631_vm13, %v1132_v35, -inf }
 0x6df   : > { %1142 = vmax.xlane.f32.xlu2 %v1141_v37  ;;  %v989_v13 = vsel %vm631_vm13, %v1776_v11, 0.0 }
 0x6e0   : > { %1777 = vpow2.f32 %v985_v36  ;;  %990 = vadd.xlane.f32.xlu0 %v989_v13  ;;  %v1216_v36 = vld [vmem:[%s2299_s5 + $0x18] sm:$0xff] }
 0x6e3   : > { %v1009_v38 = vpop.permute.xlu2 %1008  ;;  %v979_v43 = vpop.xlane.xlu0 %978 }
 0x6e4   : > { %1662 = vmatpush.msk.msra.mxu3 %vm683_vm15, %v1009_v38  ;;  %v982_v44 = vsub.f32 %v968_v9, %v979_v43 }
 0x6e5   : > { %v1135_v39 = vpop.f32.mrf.mxu0 }
 0x6e6   : > { %v1778_v40 = vpop.eup %1777  ;;  %v1144_v41 = vsel %vm638_vm14, %v1135_v39, -inf  ;;  %v987_v45 = vmul.f32 1.442695, %v982_v44 }
 0x6e7   : > { %1145 = vmax.xlane.f32.xlu1 %v1144_v41  ;;  %v992_v42 = vsel %vm631_vm13, %v1778_v40, 0.0 }
 0x6e8   : > { %993 = vadd.xlane.f32.xlu0 %v992_v42  ;;  %1779 = vpow2.f32 %v987_v45 }
 0x6ee   : > { %v1780_v46 = vpop.eup %1779 }
 0x6ef   : > { %v995_v47 = vsel %vm638_vm14, %v1780_v46, 0.0 }
 0x6f7   : > { %1731 = vrot.lane.b32.xlu2 %v2005_v32, %s1830_s16 }
 0x700   : > { %1726 = vrot.lane.b32.xlu1 %v2005_v32, %s1829_s30 }
 0x72a   : > { %996 = vadd.xlane.f32.xlu1 %v995_v47 }
 0x74a   : > { %v1140_v48 = vpop.xlane.xlu1 %1139 }
 0x74b   : > { %v1147_v49 = vsub.f32 %v1129_v33, %v1140_v48 }
 0x74d   : > { %v1150_v50 = vmul.f32 1.442695, %v1147_v49 }
 0x74f   : > { %1781 = vpow2.f32 %v1150_v50 }
 0x752   : > { %v1143_v51 = vpop.xlane.xlu2 %1142 }
 0x753   : > { %v1148_v52 = vsub.f32 %v1132_v35, %v1143_v51  ;;  %v991_v25 = vpop.xlane.xlu0 %990 }
 0x755   : > { %v1782_v53 = vpop.eup %1781  ;;  %v1152_v54 = vmul.f32 1.442695, %v1148_v52 }
 0x756   : > { %v1156_v55 = vsel %vm631_vm13, %v1782_v53, 0.0 }
 0x757   : > { %1783 = vpow2.f32 %v1152_v54  ;;  %1157 = vadd.xlane.f32.xlu0 %v1156_v55 }
 0x758   : > { %1785 = vrcp.f32 %v991_v25 }
 0x75a   : > { %v1146_v56 = vpop.xlane.xlu1 %1145  ;;  %v1732_v14 = vpop.permute.xlu2 %1731 }
 0x75b   : > { %v994_v57 = vpop.xlane.xlu0 %993  ;;  %v1149_v3 = vsub.f32 %v1135_v39, %v1146_v56  ;;  %v1733_v28 = vunpack.i.l.bf16 %v1732_v14  ;;  %v1734_v29 = vunpack.i.h.bf16 %v1732_v14 }
 0x75c   : > { %1787 = vrcp.f32 %v994_v57 }
 0x75d   : > { %v1784_v32 = vpop.eup %1783  ;;  %v1154_v5 = vmul.f32 1.442695, %v1149_v3  ;;  %v1339_v3 = vld [vmem:[%s2303_s9 + $0x8] sm:$0xff] }
 0x75e   : > { %v1159_v19 = vsel %vm631_vm13, %v1784_v32, 0.0  ;;  %v1786_v59 = vpop.eup %1785 }
 0x75f   : > { %1160 = vadd.xlane.f32.xlu2 %v1159_v19  ;;  %v1001_v62 = vmul.f32 %v1786_v59, %v1776_v11  ;;  %1789 = vpow2.f32 %v1154_v5  ;;  %v1338_v5 = vld [vmem:[%s2303_s9] sm:$0xff] }
 0x762   : > { %v1788_v63 = vpop.eup %1787 }
 0x763   : > { %v1002_v2 = vmul.f32 %v1788_v63, %v1778_v40  ;;  %v1341_v63 = vld [vmem:[%s2303_s9 + $0x18] sm:$0xff] }
 0x764   : > { %1367 = vmatpush.msrb.mxu2 %v1341_v63 }
 0x76b   : > { %1175 = vrot.lane.b32.xlu0 %v1975_v17, %s1830_s16  ;;  %v1790_v17 = vpop.eup %1789 }
 0x76c   : > { %v1162_v6 = vsel %vm638_vm14, %v1790_v17, 0.0 }
 0x772   : > { %v1727_v58 = vpop.permute.xlu1 %1726 }
 0x773   : > { %v1728_v60 = vunpack.i.l.bf16 %v1727_v58  ;;  %v1729_v61 = vunpack.i.h.bf16 %v1727_v58 }
 0x775   : > { %1037 = vmatpush.msra.mxu3 %v1728_v60 }
 0x777   : > { %1038 = vmatpush.msra.mxu3 %v1729_v61 }
 0x778   : > { %1663 = vmatmul.msk.f32.vlgmr.msra.gmra.mxu3 %vm631_vm13, %v1001_v62 }
 0x779   : > { %1241 = vmatpush.msrb.mxu3 %v1216_v36 }
 0x780   : > { %1664 = vmatmul.msk.f32.gmra.mxu3 %vm631_vm13, %v1002_v2  ;;  %v1340_v2 = vld [vmem:[%s2303_s9 + $0x10] sm:$0xff] }
 0x781   : > { %1368 = vmatpush.msrb.mxu2 %v1340_v2 }
 0x783   : > { %1369 = vmatpush.msrb.mxu2 %v1339_v3 }
 0x785   : > { %1370 = vmatpush.msrb.mxu2 %v1338_v5  ;;  %v1519_v5 = vld [vmem:[%s2305_s11 + $0x30] sm:$0xff] }
 0x795   : > { %1163 = vadd.xlane.f32.xlu0 %v1162_v6 }
 0x79d   : > { %v997_v7 = vpop.xlane.xlu1 %996 }
 0x79e   : > { %1791 = vrcp.f32 %v997_v7 }
 0x7a4   : > { %v1792_v8 = vpop.eup %1791 }
 0x7a5   : > { %v1003_v9 = vmul.f32 %v1792_v8, %v1780_v46 }
 0x7a7   : > { %1665 = vmatmul.msk.f32.gmra.mxu3 %vm631_vm13, %v1003_v9 }
 0x7ca   : > { %v1158_v16 = vpop.xlane.xlu0 %1157 }
 0x7cb   : > { %1793 = vrcp.f32 %v1158_v16 }
 0x7d1   : > { %v1794_v26 = vpop.eup %1793 }
 0x7d2   : > { %v1161_v20 = vpop.xlane.xlu2 %1160  ;;  %v1168_v15 = vmul.f32 %v1794_v26, %v1782_v53 }
 0x7d3   : > { %1795 = vrcp.f32 %v1161_v20 }
 0x7d9   : > { %v1796_v31 = vpop.eup %1795 }
 0x7da   : > { %v1169_v33 = vmul.f32 %v1796_v31, %v1784_v32  ;;  %v1739_v31 = vld [vmem:[%s2301_s7] ss:$0 sm:$0xff] }
 0x7dd   : > { %v1176_v22 = vpop.permute.xlu0 %1175 }
 0x7de   : > { %1675 = vmatpush.msk.msrb.mxu1 %vm683_vm15, %v1176_v22 }
 0x7e0   : > { %1204 = vmatpush.msrb.mxu1 %v1733_v28 }
 0x7e2   : > { %1205 = vmatpush.msrb.mxu1 %v1734_v29 }
 0x7e3   : > { %1676 = vmatmul.msk.f32.vlgmr.msrb.gmra.mxu1 %vm631_vm13, %v1168_v15 }
 0x7eb   : > { %1677 = vmatmul.msk.f32.gmra.mxu1 %vm631_vm13, %v1169_v33 }
 0x7fb   : > { %v1040_v34 = vpop.f32.mrf.mxu3 }
 0x7fc   : > { %1666 = vmatmul.msk.f32.vlgmr.msra.gmra.mxu2 %vm589_vm12, %v1040_v34 }
 0x803   : > { %v1043_v23 = vpop.f32.mrf.mxu3 }
 0x804   : > { %1667 = vmatmul.msk.f32.gmra.mxu2 %vm589_vm12, %v1043_v23 }
 0x808   : > { %v1164_v10 = vpop.xlane.xlu0 %1163 }
 0x809   : > { %1797 = vrcp.f32 %v1164_v10  ;;  %v1740_v10 = vld [vmem:[%s2302_s8] ss:$0 sm:$0xff] }
 0x80f   : > { %v1798_v24 = vpop.eup %1797 }
 0x810   : > { %v1170_v35 = vmul.f32 %v1798_v24, %v1790_v17 }
 0x812   : > { %1678 = vmatmul.msk.f32.gmra.mxu1 %vm631_vm13, %v1170_v35 }
 0x82a   : > { %v1046_v11 = vpop.f32.mrf.mxu3 }
 0x82b   : > { %1668 = vmatmul.msk.f32.gmra.mxu2 %vm589_vm12, %v1046_v11 }
 0x860   : > { %v1207_v37 = vpop.f32.mrf.mxu1 }
 0x861   : > { %1679 = vmatmul.msk.f32.vlgmr.msrb.gmra.mxu3 %vm589_vm12, %v1207_v37 }
 0x868   : > { %v1210_v13 = vpop.f32.mrf.mxu1 }
 0x869   : > { %1680 = vmatmul.msk.f32.gmra.mxu3 %vm589_vm12, %v1210_v13 }
 0x87f   : > { %v1076_v39 = vpop.f32.mrf.mxu2 }
 0x880   : > { %v1085_v40 = vadd.f32 %v1076_v39, %v2102_v21 }
 0x887   : > { %v1079_v44 = vpop.f32.mrf.mxu2 }
 0x888   : > { %v1086_v46 = vadd.f32 %v1079_v44, %v2105_v27 }
 0x88f   : > { %v1213_v38 = vpop.f32.mrf.mxu1 }
 0x890   : > { %1681 = vmatmul.msk.f32.gmra.mxu3 %vm589_vm12, %v1213_v38 }
 0x8ae   : > { %v1082_v50 = vpop.f32.mrf.mxu2 }
 0x8e4   : > { %v1243_v41 = vpop.f32.mrf.mxu3 }
 0x8e5   : > { %v1252_v42 = vadd.f32 %v1243_v41, %v1085_v40 }
 0x8e7   : > { %v2145_v43 = vadd.f32 %v1252_v42, %v1919_v1  ;;  %v1087_v1 = vadd.f32 %v1082_v50, %v2108_v30 }
 0x8e9   : > { %v1258_v45 = vsel %vm444_vm0, %v2145_v43, 0.0 }
 0x8ea   : > { %1259 = vadd.xlane.f32.xlu1 %v1258_v45 }
 0x8ec   : > { %v1246_v47 = vpop.f32.mrf.mxu3 }
 0x8ed   : > { %v1253_v48 = vadd.f32 %v1246_v47, %v1086_v46 }
 0x8ef   : > { %v2151_v49 = vadd.f32 %v1253_v48, %v1917_v0 }
 0x8f1   : > { %v1261_v21 = vsel %vm444_vm0, %v2151_v49, 0.0 }
 0x8f2   : > { %1262 = vadd.xlane.f32.xlu2 %v1261_v21 }
 0x913   : > { %v1249_v51 = vpop.f32.mrf.mxu3 }
 0x914   : > { %v1254_v52 = vadd.f32 %v1249_v51, %v1087_v1 }
 0x916   : > { %v2157_v53 = vadd.f32 %v1254_v52, %v1925_v4 }
 0x918   : > { %v1264_v27 = vsel %vm451_vm1, %v2157_v53, 0.0 }
 0x919   : > { %1265 = vadd.xlane.f32.xlu1 %v1264_v27 }
 0x95d   : > { %v1260_v54 = vpop.xlane.xlu1 %1259 }
 0x95e   : > { %v1267_v0 = vmul.f32 %v1260_v54, %v1929_v12  ;;  %v1527_v54 = vld [vmem:[%s2305_s11 + $0x70] sm:$0xff] }
 0x960   : > { %v1270_v55 = vsub.f32 %v2145_v43, %v1267_v0  ;;  %v1526_v0 = vld [vmem:[%s2305_s11 + $0x68] sm:$0xff] }
 0x962   : > { %v1273_v32 = vmul.f32 %v1270_v55, %v1270_v55 }
 0x964   : > { %v1276_v19 = vsel %vm444_vm0, %v1273_v32, 0.0  ;;  %v1525_v32 = vld [vmem:[%s2305_s11 + $0x60] sm:$0xff] }
 0x965   : > { %1277 = vadd.xlane.f32.xlu2 %v1276_v19  ;;  %v1263_v25 = vpop.xlane.xlu2 %1262  ;;  %v1524_v19 = vld [vmem:[%s2305_s11 + $0x58] sm:$0xff] }
 0x966   : > { %v1268_v30 = vmul.f32 %v1263_v25, %v1929_v12 }
 0x968   : > { %v1271_v56 = vsub.f32 %v2151_v49, %v1268_v30 }
 0x96a   : > { %v1274_v4 = vmul.f32 %v1271_v56, %v1271_v56 }
 0x96c   : > { %v1279_v57 = vsel %vm444_vm0, %v1274_v4, 0.0 }
 0x96d   : > { %1280 = vadd.xlane.f32.xlu0 %v1279_v57  ;;  %v1522_v57 = vld [vmem:[%s2305_s11 + $0x48] sm:$0xff] }
 0x98c   : > { %v1266_v58 = vpop.xlane.xlu1 %1265 }
 0x98d   : > { %v1269_v59 = vmul.f32 %v1266_v58, %v1929_v12 }
 0x98f   : > { %v2169_v60 = vsub.f32 %v2157_v53, %v1269_v59  ;;  %v1521_v59 = vld [vmem:[%s2305_s11 + $0x40] sm:$0xff] }
 0x991   : > { %v1275_v61 = vmul.f32 %v2169_v60, %v2169_v60 }
 0x993   : > { %v1282_v62 = vsel %vm451_vm1, %v1275_v61, 0.0  ;;  %v1520_v61 = vld [vmem:[%s2305_s11 + $0x38] sm:$0xff] }
 0x994   : > { %1283 = vadd.xlane.f32.xlu1 %v1282_v62 }
 0x9d8   : > { %v1278_v17 = vpop.xlane.xlu2 %1277 }
 0x9d9   : > { %v1285_v6 = vmul.f32 %v1278_v17, %v1929_v12 }
 0x9db   : > { %v1288_v7 = vadd.f32 1e-06, %v1285_v6 }
 0x9dd   : > { %1799 = vrsqrt.f32 %v1288_v7  ;;  %vm1297_vm3 = vweird.f32 %v1288_v7 }
 0x9e0   : > { %v1281_v8 = vpop.xlane.xlu0 %1280 }
 0x9e1   : > { %v1286_v9 = vmul.f32 %v1281_v8, %v1929_v12 }
 0x9e3   : > { %v1800_v14 = vpop.eup %1799  ;;  %v1289_v16 = vadd.f32 1e-06, %v1286_v9 }
 0x9e4   : > { %v1292_v18 = vmul.f32 %v1800_v14, %v1288_v7  ;;  %vm1298_vm2 = vweird.f32 %v1800_v14  ;;  %v1518_v7 = vld [vmem:[%s2305_s11 + $0x28] sm:$0xff] }
 0x9e5   : > { %1801 = vrsqrt.f32 %v1289_v16  ;;  %vm1299_vm4 = vmor %vm1297_vm3, %vm1298_vm2  ;;  %vm1307_vm6 = vweird.f32 %v1289_v16 }
 0x9e6   : > { %v1293_v20 = vmul.f32 %v1800_v14, %v1292_v18 }
 0x9e8   : > { %v1294_v22 = vmul.f32 0.5, %v1293_v20 }
 0x9ea   : > { %v1295_v26 = vsub.f32 1.5, %v1294_v22  ;;  %v1516_v22 = vld [vmem:[%s2305_s11 + $0x18] sm:$0xff] }
 0x9eb   : > { %v1802_v28 = vpop.eup %1801 }
 0x9ec   : > { %v1296_v29 = vmul.f32 %v1800_v14, %v1295_v26  ;;  %v1302_v15 = vmul.f32 %v1802_v28, %v1289_v16  ;;  %vm1308_vm5 = vweird.f32 %v1802_v28  ;;  %v1517_v16 = vld [vmem:[%s2305_s11 + $0x20] sm:$0xff] }
 0x9ed   : > { %vm1309_vm7 = vmor %vm1307_vm6, %vm1308_vm5 }
 0x9ee   : > { %v1300_v33 = vsel %vm1299_vm4, %v1800_v14, %v1296_v29  ;;  %v1303_v34 = vmul.f32 %v1802_v28, %v1302_v15  ;;  %v1515_v15 = vld [vmem:[%s2305_s11 + $0x10] sm:$0xff] }
 0x9ef   : > { %v1321_v23 = vmul.f32 %v1300_v33, %v1270_v55  ;;  %v2211_v55 = vld [vmem:[%s2304_s10] ss:$0 sm:$0xff] }
 0x9f0   : > { %v1304_v24 = vmul.f32 0.5, %v1303_v34 }
 0x9f1   : > { %v1328_v35 = vmul.f32 %v1739_v31, %v1321_v23  ;;  %v1514_v23 = vld [vmem:[%s2305_s11 + $0x8] sm:$0xff] }
 0x9f2   : > { %v1305_v11 = vsub.f32 1.5, %v1304_v24 }
 0x9f3   : > { %v1335_v36 = vadd.f32 %v1740_v10, %v1328_v35 }
 0x9f4   : > { %v1306_v37 = vmul.f32 %v1802_v28, %v1305_v11 }
 0x9f5   : > { %1682 = vmatmul.msk.f32.vlgmr.msrb.gmra.mxu2 %vm444_vm0, %v1335_v36  ;;  %v1513_v36 = vld [vmem:[%s2305_s11] sm:$0xff] }
 0x9f6   : > { %v1310_v13 = vsel %vm1309_vm7, %v1802_v28, %v1306_v37 }
 0x9f7   : > { %v1322_v38 = vmul.f32 %v1310_v13, %v1271_v56  ;;  %v1523_v56 = vld [vmem:[%s2305_s11 + $0x50] sm:$0xff] }
 0x9f9   : > { %v1329_v39 = vmul.f32 %v1739_v31, %v1322_v38 }
 0x9fb   : > { %v1336_v40 = vadd.f32 %v1740_v10, %v1329_v39 }
 0x9fd   : > { %1683 = vmatmul.msk.f32.gmra.mxu2 %vm444_vm0, %v1336_v40 }
 0xa07   : > { %v1284_v41 = vpop.xlane.xlu1 %1283 }
 0xa08   : > { %v1287_v42 = vmul.f32 %v1284_v41, %v1929_v12  ;;  %v1528_v12 = vld [vmem:[%s2305_s11 + $0x78] sm:$0xff] }
 0xa09   : > { %1533 = vmatpush.msrb.mxu0 %v1528_v12 }
 0xa0a   : > { %v1290_v44 = vadd.f32 1e-06, %v1287_v42 }
 0xa0b   : > { %1534 = vmatpush.msrb.mxu0 %v1527_v54 }
 0xa0c   : > { %1803 = vrsqrt.f32 %v1290_v44  ;;  %vm1317_vm9 = vweird.f32 %v1290_v44 }
 0xa0d   : > { %1535 = vmatpush.msrb.mxu0 %v1526_v0 }
 0xa0f   : > { %1536 = vmatpush.msrb.mxu0 %v1525_v32 }
 0xa11   : > { %1537 = vmatpush.msrb.mxu0 %v1524_v19 }
 0xa12   : > { %v1804_v45 = vpop.eup %1803 }
 0xa13   : > { %v1312_v46 = vmul.f32 %v1804_v45, %v1290_v44  ;;  %vm1318_vm8 = vweird.f32 %v1804_v45  ;;  %1538 = vmatpush.msrb.mxu0 %v1523_v56 }
 0xa14   : > { %vm1319_vm10 = vmor %vm1317_vm9, %vm1318_vm8 }
 0xa15   : > { %v1313_v47 = vmul.f32 %v1804_v45, %v1312_v46  ;;  %1539 = vmatpush.msrb.mxu0 %v1522_v57 }
 0xa17   : > { %v1314_v48 = vmul.f32 0.5, %v1313_v47  ;;  %1540 = vmatpush.msrb.mxu0 %v1521_v59 }
 0xa19   : > { %v1315_v21 = vsub.f32 1.5, %v1314_v48  ;;  %1541 = vmatpush.msrb.mxu0 %v1520_v61 }
 0xa1b   : > { %v1316_v50 = vmul.f32 %v1804_v45, %v1315_v21  ;;  %1542 = vmatpush.msrb.mxu0 %v1519_v5 }
 0xa1d   : > { %v1320_v1 = vsel %vm1319_vm10, %v1804_v45, %v1316_v50  ;;  %1543 = vmatpush.msrb.mxu0 %v1518_v7 }
 0xa1e   : > { %v1323_v51 = vmul.f32 %v1320_v1, %v2169_v60 }
 0xa1f   : > { %1544 = vmatpush.msrb.mxu0 %v1517_v16 }
 0xa20   : > { %v1330_v52 = vmul.f32 %v1739_v31, %v1323_v51 }
 0xa21   : > { %1545 = vmatpush.msrb.mxu0 %v1516_v22 }
 0xa22   : > { %v1337_v27 = vadd.f32 %v1740_v10, %v1330_v52 }
 0xa23   : > { %1546 = vmatpush.msrb.mxu0 %v1515_v15 }
 0xa24   : > { %1684 = vmatmul.msk.f32.gmra.mxu2 %vm444_vm0, %v1337_v27 }
 0xa25   : > { %1547 = vmatpush.msrb.mxu0 %v1514_v23 }
 0xa27   : > { %1548 = vmatpush.msrb.mxu0 %v1513_v36 }
 0xa78   : > { %v1372_v25 = vpop.f32.mrf.mxu2 }
 0xa79   : > { %v2220_v30 = vadd.f32 %v2211_v55, %v1372_v25 }
 0xa7b   : > { %v2226_v4 = vmul.f32 0.70710677, %v2220_v30  ;;  %v1381_v15 = vmul.f32 0.5, %v2220_v30 }
 0xa7d   : > { %v1387_v58 = vmul.f32 %v2226_v4, %v2226_v4 }
 0xa7f   : > { %v1388_v60 = vmin.f32 %v1387_v58, 16.0 }
 0xa80   : > { %v1375_v62 = vpop.f32.mrf.mxu2 }
 0xa81   : > { %v1389_v63 = vmul.f32 2.1237322e-06, %v1388_v60  ;;  %v1400_v2 = vmul.f32 3.8918573e-05, %v1388_v60  ;;  %v2240_v3 = vadd.f32 %v2211_v55, %v1375_v62 }
 0xa83   : > { %v1390_v17 = vadd.f32 0.00028619796, %v1389_v63  ;;  %v1401_v6 = vadd.f32 0.001143296, %v1400_v2  ;;  %v2249_v8 = vmul.f32 0.70710677, %v2240_v3 }
 0xa85   : > { %v1391_v9 = vmul.f32 %v1390_v17, %v1388_v60  ;;  %v1402_v14 = vmul.f32 %v1401_v6, %v1388_v60  ;;  %v1427_v18 = vmul.f32 %v2249_v8, %v2249_v8 }
 0xa87   : > { %v1403_v20 = vadd.f32 0.014752088, %v1402_v14  ;;  %v1392_v26 = vadd.f32 0.0036580483, %v1391_v9  ;;  %v1428_v28 = vmin.f32 %v1427_v18, 16.0 }
 0xa89   : > { %v1404_v29 = vmul.f32 %v1403_v20, %v1388_v60  ;;  %v1429_v31 = vmul.f32 2.1237322e-06, %v1428_v28  ;;  %v1440_v33 = vmul.f32 3.8918573e-05, %v1428_v28  ;;  %v1393_v10 = vmul.f32 %v1392_v26, %v1388_v60 }
 0xa8b   : > { %v1405_v34 = vadd.f32 0.112945676, %v1404_v29  ;;  %v1430_v24 = vadd.f32 0.00028619796, %v1429_v31  ;;  %v1441_v35 = vadd.f32 0.001143296, %v1440_v33 }
 0xa8c   : > { %v1394_v39 = vadd.f32 0.05243302, %v1393_v10 }
 0xa8d   : > { %v1406_v11 = vmul.f32 %v1405_v34, %v1388_v60  ;;  %v1431_v37 = vmul.f32 %v1430_v24, %v1428_v28  ;;  %v1442_v13 = vmul.f32 %v1441_v35, %v1428_v28 }
 0xa8e   : > { %v1395_v46 = vmul.f32 %v1394_v39, %v1388_v60  ;;  %v1382_v39 = vmul.f32 0.5, %v2240_v3 }
 0xa8f   : > { %v1407_v38 = vadd.f32 0.4994258, %v1406_v11  ;;  %v1443_v40 = vadd.f32 0.014752088, %v1442_v13  ;;  %v1432_v42 = vadd.f32 0.0036580483, %v1431_v37 }
 0xa90   : > { %v1396_v50 = vadd.f32 0.18741608, %v1395_v46 }
 0xa91   : > { %v1408_v41 = vmul.f32 %v1407_v38, %v1388_v60  ;;  %v1444_v44 = vmul.f32 %v1443_v40, %v1428_v28  ;;  %v1433_v48 = vmul.f32 %v1432_v42, %v1428_v28 }
 0xa92   : > { %v1397_v12 = vmul.f32 %v1396_v50, %v1388_v60 }
 0xa93   : > { %v1409_v45 = vadd.f32 1.0, %v1408_v41  ;;  %v1445_v47 = vadd.f32 0.112945676, %v1444_v44  ;;  %v1434_v51 = vadd.f32 0.05243302, %v1433_v48 }
 0xa94   : > { %v1398_v56 = vadd.f32 1.1283791, %v1397_v12 }
 0xa95   : > { %1805 = vrcp.f32 %v1409_v45  ;;  %v1446_v21 = vmul.f32 %v1445_v47, %v1428_v28  ;;  %v1435_v32 = vmul.f32 %v1434_v51, %v1428_v28  ;;  %v1421_v25 = vand.u32 2147483648, %v1409_v45 }
 0xa96   : > { %v1419_v58 = vand.u32 2147483647, %v1409_v45  ;;  %vm1415_vm12 = vweird.f32 %v1409_v45  ;;  %v1399_v2 = vmul.f32 %v1398_v56, %v2226_v4 }
 0xa97   : > { %v1447_v1 = vadd.f32 0.4994258, %v1446_v21  ;;  %v1436_v59 = vadd.f32 0.18741608, %v1435_v32  ;;  %v1422_v62 = vor.u32 1.1754944e-38, %v1421_v25 }
 0xa98   : > { %vm1420_vm14 = vcmp.eq.f32.partialorder %v1419_v58, 8.507059e+37 }
 0xa99   : > { %v1448_v52 = vmul.f32 %v1447_v1, %v1428_v28  ;;  %v1437_v17 = vmul.f32 %v1436_v59, %v1428_v28 }
 0xa9b   : > { %v1806_v27 = vpop.eup %1805  ;;  %v1449_v0 = vadd.f32 1.0, %v1448_v52  ;;  %v1438_v22 = vadd.f32 1.1283791, %v1437_v17 }
 0xa9c   : > { %v1411_v54 = vmul.f32 %v1806_v27, %v1409_v45  ;;  %vm1416_vm11 = vweird.f32 %v1806_v27 }
 0xa9d   : > { %1807 = vrcp.f32 %v1449_v0  ;;  %vm1417_vm13 = vmor %vm1415_vm12, %vm1416_vm11  ;;  %v1461_v20 = vand.u32 2147483648, %v1449_v0  ;;  %v1459_v29 = vand.u32 2147483647, %v1449_v0  ;;  %vm1455_vm2 = vweird.f32 %v1449_v0 }
 0xa9e   : > { %v1412_v19 = vsub.f32 1.0, %v1411_v54  ;;  %v1439_v10 = vmul.f32 %v1438_v22, %v2249_v8 }
 0xa9f   : > { %v1462_v23 = vor.u32 1.1754944e-38, %v1461_v20  ;;  %vm1460_vm4 = vcmp.eq.f32.partialorder %v1459_v29, 8.507059e+37 }
 0xaa0   : > { %v1413_v57 = vmul.f32 %v1806_v27, %v1412_v19 }
 0xaa2   : > { %v1414_v61 = vadd.f32 %v1806_v27, %v1413_v57 }
 0xaa3   : > { %v1808_v63 = vpop.eup %1807 }
 0xaa4   : > { %v1418_v5 = vsel %vm1417_vm13, %v1806_v27, %v1414_v61  ;;  %v1451_v6 = vmul.f32 %v1808_v63, %v1449_v0  ;;  %vm1456_vm15 = vweird.f32 %v1808_v63 }
 0xaa5   : > { %v1423_v60 = vsel %vm1420_vm14, %v1422_v62, %v1418_v5  ;;  %vm1457_vm3 = vmor %vm1455_vm2, %vm1456_vm15 }
 0xaa6   : > { %v1424_v7 = vmul.f32 %v1423_v60, %v1399_v2  ;;  %v1452_v14 = vsub.f32 1.0, %v1451_v6 }
 0xaa7   : > { %v1378_v9 = vpop.f32.mrf.mxu2 }
 0xaa8   : > { %v1685_v16 = vclamps-f32 %v1424_v7, 1.0  ;;  %v2270_v18 = vadd.f32 %v2211_v55, %v1378_v9  ;;  %v1453_v26 = vmul.f32 %v1808_v63, %v1452_v14  ;;  %v1742_v7 = vld [vmem:[%s2306_s12] ss:$0 sm:$0xff] }
 0xaaa   : > { %v1507_v4 = vadd.f32 1.0, %v1685_v16  ;;  %v1386_v31 = vmul.f32 0.70710677, %v2270_v18  ;;  %v1454_v33 = vadd.f32 %v1808_v63, %v1453_v26  ;;  %v1383_v60 = vmul.f32 0.5, %v2270_v18 }
 0xaac   : > { %v1510_v28 = vmul.f32 %v1507_v4, %v1381_v15  ;;  %v1467_v34 = vmul.f32 %v1386_v31, %v1386_v31  ;;  %v1458_v55 = vsel %vm1457_vm3, %v1808_v63, %v1454_v33 }
 0xaad   : > { %v1463_v35 = vsel %vm1460_vm4, %v1462_v23, %v1458_v55 }
 0xaae   : > { %v1468_v24 = vmin.f32 %v1467_v34, 16.0  ;;  %1549 = vmatmul.f32.vlgmr.msrb.gmra.mxu0 %v1510_v28  ;;  %v1464_v11 = vmul.f32 %v1463_v35, %v1439_v10 }
 0xab0   : > { %v1469_v36 = vmul.f32 2.1237322e-06, %v1468_v24  ;;  %v1480_v37 = vmul.f32 3.8918573e-05, %v1468_v24  ;;  %v1686_v30 = vclamps-f32 %v1464_v11, 1.0 }
 0xab2   : > { %v1470_v13 = vadd.f32 0.00028619796, %v1469_v36  ;;  %v1481_v38 = vadd.f32 0.001143296, %v1480_v37  ;;  %v1508_v40 = vadd.f32 1.0, %v1686_v30 }
 0xab4   : > { %v1471_v41 = vmul.f32 %v1470_v13, %v1468_v24  ;;  %v1482_v42 = vmul.f32 %v1481_v38, %v1468_v24  ;;  %v1511_v44 = vmul.f32 %v1508_v40, %v1382_v39 }
 0xab6   : > { %v1483_v45 = vadd.f32 0.014752088, %v1482_v42  ;;  %v1472_v46 = vadd.f32 0.0036580483, %v1471_v41  ;;  %1552 = vmatmul.f32.gmra.mxu0 %v1511_v44 }
 0xab8   : > { %v1484_v8 = vmul.f32 %v1483_v45, %v1468_v24  ;;  %v1473_v48 = vmul.f32 %v1472_v46, %v1468_v24 }
 0xaba   : > { %v1485_v47 = vadd.f32 0.112945676, %v1484_v8  ;;  %v1474_v1 = vadd.f32 0.05243302, %v1473_v48 }
 0xabc   : > { %v1486_v21 = vmul.f32 %v1485_v47, %v1468_v24  ;;  %v1475_v27 = vmul.f32 %v1474_v1, %v1468_v24 }
 0xabe   : > { %v1487_v50 = vadd.f32 0.4994258, %v1486_v21  ;;  %v1476_v12 = vadd.f32 0.18741608, %v1475_v27 }
 0xac0   : > { %v1488_v51 = vmul.f32 %v1487_v50, %v1468_v24  ;;  %v1477_v3 = vmul.f32 %v1476_v12, %v1468_v24 }
 0xac2   : > { %v1489_v52 = vadd.f32 1.0, %v1488_v51  ;;  %v1478_v25 = vadd.f32 1.1283791, %v1477_v3 }
 0xac4   : > { %1809 = vrcp.f32 %v1489_v52  ;;  %v1501_v19 = vand.u32 2147483648, %v1489_v52  ;;  %v1499_v57 = vand.u32 2147483647, %v1489_v52  ;;  %vm1495_vm6 = vweird.f32 %v1489_v52 }
 0xac5   : > { %v1479_v61 = vmul.f32 %v1478_v25, %v1386_v31 }
 0xac6   : > { %v1502_v59 = vor.u32 1.1754944e-38, %v1501_v19  ;;  %vm1500_vm8 = vcmp.eq.f32.partialorder %v1499_v57, 8.507059e+37 }
 0xaca   : > { %v1810_v54 = vpop.eup %1809 }
 0xacb   : > { %v1491_v0 = vmul.f32 %v1810_v54, %v1489_v52  ;;  %vm1496_vm5 = vweird.f32 %v1810_v54 }
 0xacc   : > { %vm1497_vm7 = vmor %vm1495_vm6, %vm1496_vm5 }
 0xacd   : > { %v1492_v32 = vsub.f32 1.0, %v1491_v0 }
 0xacf   : > { %v1493_v56 = vmul.f32 %v1810_v54, %v1492_v32 }
 0xad1   : > { %v1494_v58 = vadd.f32 %v1810_v54, %v1493_v56 }
 0xad3   : > { %v1498_v62 = vsel %vm1497_vm7, %v1810_v54, %v1494_v58 }
 0xad4   : > { %v1503_v63 = vsel %vm1500_vm8, %v1502_v59, %v1498_v62 }
 0xad5   : > { %v1504_v2 = vmul.f32 %v1503_v63, %v1479_v61 }
 0xad7   : > { %v1687_v5 = vclamps-f32 %v1504_v2, 1.0 }
 0xad9   : > { %v1509_v17 = vadd.f32 1.0, %v1687_v5 }
 0xadb   : > { %v1512_v6 = vmul.f32 %v1509_v17, %v1383_v60 }
 0xadd   : > { %1555 = vmatmul.f32.gmra.mxu0 %v1512_v6 }
 0xb2b   : > { %v1550_v9 = vpop.f32.mrf.mxu0 }
 0xb2c   : > { %v1551_v14 = vadd.f32 %v1742_v7, %v1550_v9 }
 0xb2e   : > { %v1559_v16 = vadd.f32 %v1551_v14, %v2145_v43 }
 0xb30   : > { %1562 = vst.msk [vmem:[%s440_s15] sm:$0xff] %vm444_vm0, %v1559_v16 }
 0xb33   : > { %v1553_v20 = vpop.f32.mrf.mxu0 }
 0xb34   : > { %v1554_v18 = vadd.f32 %v1742_v7, %v1553_v20 }
 0xb36   : > { %v1560_v22 = vadd.f32 %v1554_v18, %v2151_v49 }
 0xb38   : > { %1563 = vst.msk [vmem:[%s440_s15 + $0x8] sm:$0xff] %vm444_vm0, %v1560_v22 }
 0xb5a   : > { %v1556_v26 = vpop.f32.mrf.mxu0 }
 0xb5b   : > { %v1557_v29 = vadd.f32 %v1742_v7, %v1556_v26 }
 0xb5d   : > { %v1561_v15 = vadd.f32 %v1557_v29, %v2157_v53 }
 0xb5f   : > { %1564 = vst.msk [vmem:[%s440_s15 + $0x10] sm:$0x1] %vm451_vm1, %v1561_v15 }
 0xb60 PF: > { %s23_s25 = sadd.s32 1, %s1817_s25  }
 0xb61   : > { %p20_p4 = scmp.ge.s32.totalorder %s23_s25, 4  }
 0xb63   :  { %22 = sbr.rel (!%p20_p4) target bundleno = 1 (0x1), region = 102 }

</bundles_post_ra>
